<compile_context>
chip_gen: v6e
topology: v6e:2x2x1
jax: 0.10.0
libtpu: 0.0.40
codegen_flags: <defaults>
</compile_context>

<pallas_src>
import functools
import jax
import jax.numpy as jnp
from jax.experimental import pallas as pl
from jax.experimental.pallas import tpu as pltpu

_SQRT1_2 = 0.7071067811865476
_BN_EPS = 1e-5
_VMEM_LIMIT = 32 * 1024 * 1024


# ----------------------------------------------------------------------------
# small helpers
# ----------------------------------------------------------------------------
def _round_up(x, m):
    return (x + m - 1) // m * m


def _pick_wp(w_padded):
    """Lane pitch of a padded image row.  Use a multiple of 128 once the row
    is long enough that the bloat is small (enables aligned ki*wp slices)."""
    if w_padded >= 112:
        return _round_up(w_padded, 128)
    return _round_up(w_padded, 8)


def _pick_row_tile(r, per_row_bytes, budget=12 * 1024 * 1024):
    """Row-block size for the depthwise conv, sized from a VMEM budget.
    Must be a multiple of 8 dividing r, or r itself."""
    cap = max(8, budget // max(per_row_bytes, 1))
    if r % 8 != 0 or r <= 8:
        return r
    limit = min(cap, r // 2 if r >= 16 else r)   # prefer >=2 grid steps
    t = (min(limit, r) // 8) * 8
    while t >= 8:
        if r % t == 0:
            return t
        t -= 8
    return r


def _pick_lane_tile(n, per_lane_bytes, budget=6 * 1024 * 1024):
    """Lane tile (multiple of 128, capped at 2048) sized to a VMEM budget.
    Callers pad the lane axis up to a multiple of the returned tile."""
    cap = max(128, min(2048, (budget // max(per_lane_bytes, 1)) // 128 * 128))
    if n <= cap:
        return _round_up(n, 128)
    return cap


def _erf(x):
    # Abramowitz & Stegun 7.1.26 rational approximation (|err| < 1.5e-7, i.e.
    # f32 precision) -- avoids relying on a lax.erf lowering inside Mosaic.
    a1, a2, a3, a4, a5 = (0.254829592, -0.284496736, 1.421413741,
                          -1.453152027, 1.061405429)
    p = 0.3275911
    ax = jnp.abs(x)
    t = 1.0 / (1.0 + p * ax)
    poly = ((((a5 * t + a4) * t + a3) * t + a2) * t + a1) * t
    y = 1.0 - poly * jnp.exp(-ax * ax)
    return jnp.where(x >= 0, y, -y)


def _gelu_exact(x):
    # torch.nn.GELU() default (approximate='none'): 0.5*x*(1+erf(x/sqrt(2)))
    return 0.5 * x * (1.0 + _erf(x * _SQRT1_2))


# ----------------------------------------------------------------------------
# Kernel A: depthwise kxk conv + bias + GELU (lane-dense, one half per call).
# Rows are (batch, channel) pairs, lanes are the flattened padded spatial axis;
# each conv tap is a constant lane shift read directly from the input ref.
# ----------------------------------------------------------------------------
def _dw_gelu_kernel(x_ref, w_ref, b_ref, o_ref, *, k, wp, lout, hoist_kj):
    # x_ref: (rt, lin)   padded image rows flattened, f32
    # w_ref: (rt, k*k)   per-(batch,channel) taps
    # b_ref: (rt, 1)     per-(batch,channel) bias
    # o_ref: (rt, lout)  lout = H*wp (garbage cols sliced off in the wrapper)
    wv = w_ref[...]
    acc = jnp.zeros(o_ref.shape, jnp.float32)
    if hoist_kj:
        # wp % 128 == 0: one unaligned extract per kj, ki*wp slices are
        # lane-aligned (cheap vreg selection, no XLU rotate).
        span = lout + (k - 1) * wp
        for kj in range(k):
            wkj = x_ref[:, kj:kj + span]
            for ki in range(k):
                tap = wv[:, ki * k + kj:ki * k + kj + 1]
                acc = acc + wkj[:, ki * wp:ki * wp + lout] * tap
    else:
        # small rows: slice the ref per tap window (no full-block value live).
        for ki in range(k):
            base = ki * wp
            for kj in range(k):
                tap = wv[:, ki * k + kj:ki * k + kj + 1]
                acc = acc + x_ref[:, base + kj:base + kj + lout] * tap
    o_ref[...] = _gelu_exact(acc + b_ref[...])


def dwconv_gelu_half(xh, w, b, k):
    """xh: (B, dim, H, W).  Returns GELU(depthwise kxk conv, 'same' pad)."""
    B, dim, H, W = xh.shape
    p = (k - 1) // 2
    wp = _pick_wp(W + 2 * p)
    rows = H + 2 * p + 1                 # +1 guard row keeps all tap slices in bounds
    lin, lout = rows * wp, H * wp

    xp = jnp.pad(xh.astype(jnp.float32),
                 ((0, 0), (0, 0), (p, rows - H - p), (p, wp - W - p)))
    xf = xp.reshape(B * dim, lin)        # row index = b*dim + c (pure reshape)
    wr = jnp.tile(w.reshape(dim, k * k), (B, 1)).astype(jnp.float32)
    br = jnp.tile(b.astype(jnp.float32), (B,)).reshape(B * dim, 1)

    R = B * dim
    rt = _pick_row_tile(R, (lin + lout + k * k + 1) * 8)  # f32, double-buffered
    kern = functools.partial(_dw_gelu_kernel, k=k, wp=wp, lout=lout,
                             hoist_kj=(wp % 128 == 0))
    out = pl.pallas_call(
        kern,
        out_shape=jax.ShapeDtypeStruct((R, lout), jnp.float32),
        grid=(R // rt,),
        in_specs=[
            pl.BlockSpec((rt, lin), lambda i: (i, 0)),
            pl.BlockSpec((rt, k * k), lambda i: (i, 0)),
            pl.BlockSpec((rt, 1), lambda i: (i, 0)),
        ],
        out_specs=pl.BlockSpec((rt, lout), lambda i: (i, 0)),
        compiler_params=pltpu.CompilerParams(
            dimension_semantics=("parallel",),
            vmem_limit_bytes=_VMEM_LIMIT),
    )(xf, wr, br)
    return out.reshape(B, dim, H, wp)[..., :W]


# ----------------------------------------------------------------------------
# Kernel B: 1x1 conv (channel-mixing matmul) + BatchNorm(batch stats) + ReLU.
# Split into a fully-parallel stats pass (emits per-tile partial sums only)
# and a fully-parallel normalize pass (no garbage output writebacks).
# ----------------------------------------------------------------------------
def _mix_stats_kernel(x_ref, w_ref, s1_ref, s2_ref):
    # x_ref: (1, Cin, tn) bf16; w_ref: (Cout, Cin) bf16
    y = jnp.dot(w_ref[...], x_ref[0], preferred_element_type=jnp.float32)
    s1_ref[0] = jnp.sum(y, axis=1, keepdims=True)
    s2_ref[0] = jnp.sum(y * y, axis=1, keepdims=True)


def _mix_norm_kernel(x_ref, w_ref, sc_ref, sh_ref, o_ref):
    y = jnp.dot(w_ref[...], x_ref[0], preferred_element_type=jnp.float32)
    o_ref[0] = jnp.maximum(y * sc_ref[...] + sh_ref[...], 0.0)


def _bn_affine(s1, s2, gamma, beta, true_n):
    """Combine per-tile partial sums into the BN scale/shift (tiny jnp glue).
    Zero-padded lanes contribute nothing; denominators use the true count."""
    mean = jnp.sum(s1, axis=0)[:, 0] / float(true_n)       # (C,)
    ex2 = jnp.sum(s2, axis=0)[:, 0] / float(true_n)
    var = jnp.maximum(ex2 - mean * mean, 0.0)
    inv = jax.lax.rsqrt(var + _BN_EPS)
    scale = gamma.astype(jnp.float32) * inv
    shift = beta.astype(jnp.float32) - mean * scale
    return scale.reshape(-1, 1), shift.reshape(-1, 1)


def mix_bn_relu(f3, w_mat, gamma, beta, true_n, tn):
    """f3: (B, Cin, npad) bf16, zero-padded on lanes; w_mat: (Cout, Cin) bf16."""
    B, Cin, npad = f3.shape
    Cout = w_mat.shape[0]
    nt = npad // tn
    cp = pltpu.CompilerParams(dimension_semantics=("parallel", "parallel"),
                              vmem_limit_bytes=_VMEM_LIMIT)
    stat_spec = pl.BlockSpec((1, Cout, 1), lambda b, t: (b * nt + t, 0, 0))
    s1, s2 = pl.pallas_call(
        _mix_stats_kernel,
        out_shape=(jax.ShapeDtypeStruct((B * nt, Cout, 1), jnp.float32),
                   jax.ShapeDtypeStruct((B * nt, Cout, 1), jnp.float32)),
        grid=(B, nt),
        in_specs=[
            pl.BlockSpec((1, Cin, tn), lambda b, t: (b, 0, t)),
            pl.BlockSpec((Cout, Cin), lambda b, t: (0, 0)),
        ],
        out_specs=(stat_spec, stat_spec),
        compiler_params=cp,
    )(f3, w_mat)
    scale, shift = _bn_affine(s1, s2, gamma, beta, true_n)
    return pl.pallas_call(
        _mix_norm_kernel,
        out_shape=jax.ShapeDtypeStruct((B, Cout, npad), jnp.float32),
        grid=(B, nt),
        in_specs=[
            pl.BlockSpec((1, Cin, tn), lambda b, t: (b, 0, t)),
            pl.BlockSpec((Cout, Cin), lambda b, t: (0, 0)),
            pl.BlockSpec((Cout, 1), lambda b, t: (0, 0)),
            pl.BlockSpec((Cout, 1), lambda b, t: (0, 0)),
        ],
        out_specs=pl.BlockSpec((1, Cout, tn), lambda b, t: (b, 0, t)),
        compiler_params=cp,
    )(f3, w_mat, scale, shift)


# ----------------------------------------------------------------------------
# Kernel C: residual add + BatchNorm(batch stats) + ReLU (same two-pass split)
# ----------------------------------------------------------------------------
def _add_stats_kernel(a_ref, b_ref, s1_ref, s2_ref):
    z = a_ref[0] + b_ref[0]
    s1_ref[0] = jnp.sum(z, axis=1, keepdims=True)
    s2_ref[0] = jnp.sum(z * z, axis=1, keepdims=True)


def _add_norm_kernel(a_ref, b_ref, sc_ref, sh_ref, o_ref):
    z = a_ref[0] + b_ref[0]
    o_ref[0] = jnp.maximum(z * sc_ref[...] + sh_ref[...], 0.0)


def add_bn_relu(a3, b3, gamma, beta, true_n, tn):
    """a3, b3: (B, C, npad) f32, zero-padded on lanes."""
    B, C, npad = a3.shape
    nt = npad // tn
    cp = pltpu.CompilerParams(dimension_semantics=("parallel", "parallel"),
                              vmem_limit_bytes=_VMEM_LIMIT)
    data_spec = pl.BlockSpec((1, C, tn), lambda b, t: (b, 0, t))
    stat_spec = pl.BlockSpec((1, C, 1), lambda b, t: (b * nt + t, 0, 0))
    s1, s2 = pl.pallas_call(
        _add_stats_kernel,
        out_shape=(jax.ShapeDtypeStruct((B * nt, C, 1), jnp.float32),
                   jax.ShapeDtypeStruct((B * nt, C, 1), jnp.float32)),
        grid=(B, nt),
        in_specs=[data_spec, data_spec],
        out_specs=(stat_spec, stat_spec),
        compiler_params=cp,
    )(a3, b3)
    scale, shift = _bn_affine(s1, s2, gamma, beta, true_n)
    return pl.pallas_call(
        _add_norm_kernel,
        out_shape=jax.ShapeDtypeStruct((B, C, npad), jnp.float32),
        grid=(B, nt),
        in_specs=[data_spec, data_spec,
                  pl.BlockSpec((C, 1), lambda b, t: (0, 0)),
                  pl.BlockSpec((C, 1), lambda b, t: (0, 0))],
        out_specs=pl.BlockSpec((1, C, tn), lambda b, t: (b, 0, t)),
        compiler_params=cp,
    )(a3, b3, scale, shift)


# ----------------------------------------------------------------------------
# FourierUnit: FFT glue in plain JAX, conv+BN+ReLU hot path in Pallas
# ----------------------------------------------------------------------------
def fourier_unit(x0, conv_w, bn_g, bn_b):
    # x0: (B, C, H, W), conv_w: (2C, 2C, 1, 1), bn_g/bn_b: (2C,)
    B, C, H, W = x0.shape
    # TODO(synk): rfft2/irfft2 have no Pallas primitive; computed with jnp.fft.
    ff = jnp.fft.rfft2(x0, norm='ortho')                       # (B, C, H, Wf)
    Wf = ff.shape[-1]
    # channel order [re_0, im_0, re_1, im_1, ...] == torch permute/view order
    f = jnp.stack([jnp.real(ff), jnp.imag(ff)], axis=2).reshape(B, 2 * C, H, Wf)
    C4 = 2 * C
    nhw = H * Wf
    tn = _pick_lane_tile(nhw, per_lane_bytes=(2 * C4 + 4 * C4) * 2)
    npad = _round_up(nhw, tn)
    # bf16 staging in the wrapper: halves the dominant HBM read stream of the
    # two matmul passes; the MXU consumes bf16 operands either way.
    f3 = jnp.pad(f.reshape(B, C4, nhw),
                 ((0, 0), (0, 0), (0, npad - nhw))).astype(jnp.bfloat16)
    y3 = mix_bn_relu(f3, conv_w.reshape(C4, C4).astype(jnp.bfloat16),
                     bn_g, bn_b, true_n=B * nhw, tn=tn)        # Pallas x2
    y = y3[..., :nhw].reshape(B, C, 2, H, Wf)
    yc = jax.lax.complex(y[:, :, 0], y[:, :, 1])               # view_as_complex
    return jnp.fft.irfft2(yc, s=(H, W), norm='ortho').astype(jnp.float32)


# ----------------------------------------------------------------------------
# FDSM forward
# ----------------------------------------------------------------------------
def fdsm_forward(x, params):
    B, C2, H, W = x.shape             # C2 = 2*dim (static under jit)
    dim = C2 // 2

    # split + depthwise conv + GELU (two Pallas calls, no padded-5x5 waste)
    x1 = dwconv_gelu_half(x[:, :dim], params['w_dw3'], params['b_dw3'], k=3)
    x2 = dwconv_gelu_half(x[:, dim:], params['w_dw5'], params['b_dw5'], k=5)
    x0 = jnp.concatenate([x1, x2], axis=1)                      # (B, C2, H, W)

    ffc = fourier_unit(x0, params['w_ffc'], params['g_ffc'], params['b_ffc'])

    nsp = H * W
    tn = _pick_lane_tile(nsp, per_lane_bytes=3 * 4 * C2 * 2)
    npad = _round_up(nsp, tn)
    pad = ((0, 0), (0, 0), (0, npad - nsp))
    a3 = jnp.pad(ffc.reshape(B, C2, nsp), pad)                  # cheap reshapes,
    b3 = jnp.pad(x0.reshape(B, C2, nsp).astype(jnp.float32), pad)  # no transposes
    o3 = add_bn_relu(a3, b3, params['g_bn'], params['b_bn'],
                     true_n=B * nsp, tn=tn)                     # Pallas x2
    return o3[..., :nsp].reshape(B, C2, H, W)


def init_params(key, dim):
    ks = jax.random.split(key, 5)
    c4 = 4 * dim
    return {
        # conv_init_1: Conv2d(dim, dim, 3, groups=dim) -> weight (dim,1,3,3)
        'w_dw3': 0.1 * jax.random.normal(ks[0], (dim, 1, 3, 3), jnp.float32),
        'b_dw3': 0.1 * jax.random.normal(ks[1], (dim,), jnp.float32),
        # conv_init_2: Conv2d(dim, dim, 5, groups=dim) -> weight (dim,1,5,5)
        'w_dw5': 0.1 * jax.random.normal(ks[2], (dim, 1, 5, 5), jnp.float32),
        'b_dw5': 0.1 * jax.random.normal(ks[3], (dim,), jnp.float32),
        # FFC.conv_layer: Conv2d(4*dim, 4*dim, 1, bias=False)
        'w_ffc': 0.1 * jax.random.normal(ks[4], (c4, c4, 1, 1), jnp.float32),
        # FFC.bn (BatchNorm2d(4*dim)) default init
        'g_ffc': jnp.ones((c4,), jnp.float32),
        'b_ffc': jnp.zeros((c4,), jnp.float32),
        # final bn (BatchNorm2d(2*dim)) default init
        'g_bn': jnp.ones((2 * dim,), jnp.float32),
        'b_bn': jnp.zeros((2 * dim,), jnp.float32),
    }


if __name__ == "__main__":
    key = jax.random.PRNGKey(0)
    dim = 4                       # FDSM(dim=4): input has 2*dim = 8 channels
    B, H, W = 2, 16, 16
    k_in, k_par = jax.random.split(key)
    x = jax.random.normal(k_in, (B, 2 * dim, H, W), jnp.float32)
    params = init_params(k_par, dim)

    out = jax.jit(fdsm_forward)(x, params)
    out = jax.block_until_ready(out)
    assert out.shape == (B, 2 * dim, H, W), out.shape
    assert bool(jnp.all(jnp.isfinite(out)))
    print("KERNEL_OK")
</pallas_src>

<mosaic_0001>
module attributes {stable_mosaic.version = 11 : i64} {
  func.func @_dw_gelu_kernel(%arg0: i32, %arg1: memref<8x456xf32, #tpu.memory_space<vmem>>, %arg2: memref<8x9xf32, #tpu.memory_space<vmem>>, %arg3: memref<8x1xf32, #tpu.memory_space<vmem>>, %arg4: memref<8x384xf32, #tpu.memory_space<vmem>>) attributes {dimension_semantics = [#tpu.dimension_semantics<parallel>], iteration_bounds = array<i64: 1>, scalar_prefetch = 0 : i64, scratch_operands = 0 : i64, tpu.core_type = #tpu.core_type<tc>, window_params = [{transform_indices = @transform_0, window_bounds = array<i64: 8, 456>}, {transform_indices = @transform_1, window_bounds = array<i64: 8, 9>}, {transform_indices = @transform_2, window_bounds = array<i64: 8, 1>}, {transform_indices = @transform_3, window_bounds = array<i64: 8, 384>}]} {
    %c0 = arith.constant 0 : index
    %c0_0 = arith.constant 0 : index
    %0 = vector.load %arg2[%c0, %c0_0] : memref<8x9xf32, #tpu.memory_space<vmem>>, vector<8x9xf32>
    %cst = arith.constant 0.000000e+00 : f32
    %1 = vector.broadcast %cst : f32 to vector<8x384xf32>
    %2 = vector.extract_strided_slice %0 {offsets = [0, 0], sizes = [8, 1], strides = [1, 1]} : vector<8x9xf32> to vector<8x1xf32>
    %c0_1 = arith.constant 0 : index
    %c0_2 = arith.constant 0 : index
    %3 = vector.load %arg1[%c0_1, %c0_2] : memref<8x456xf32, #tpu.memory_space<vmem>>, vector<8x384xf32>
    %4 = vector.broadcast %2 : vector<8x1xf32> to vector<8x384xf32>
    %5 = arith.mulf %3, %4 : vector<8x384xf32>
    %6 = arith.addf %1, %5 : vector<8x384xf32>
    %7 = vector.extract_strided_slice %0 {offsets = [0, 1], sizes = [8, 1], strides = [1, 1]} : vector<8x9xf32> to vector<8x1xf32>
    %c0_3 = arith.constant 0 : index
    %c1 = arith.constant 1 : index
    %8 = vector.load %arg1[%c0_3, %c1] : memref<8x456xf32, #tpu.memory_space<vmem>>, vector<8x384xf32>
    %9 = vector.broadcast %7 : vector<8x1xf32> to vector<8x384xf32>
    %10 = arith.mulf %8, %9 : vector<8x384xf32>
    %11 = arith.addf %6, %10 : vector<8x384xf32>
    %12 = vector.extract_strided_slice %0 {offsets = [0, 2], sizes = [8, 1], strides = [1, 1]} : vector<8x9xf32> to vector<8x1xf32>
    %c0_4 = arith.constant 0 : index
    %c2 = arith.constant 2 : index
    %13 = vector.load %arg1[%c0_4, %c2] : memref<8x456xf32, #tpu.memory_space<vmem>>, vector<8x384xf32>
    %14 = vector.broadcast %12 : vector<8x1xf32> to vector<8x384xf32>
    %15 = arith.mulf %13, %14 : vector<8x384xf32>
    %16 = arith.addf %11, %15 : vector<8x384xf32>
    %17 = vector.extract_strided_slice %0 {offsets = [0, 3], sizes = [8, 1], strides = [1, 1]} : vector<8x9xf32> to vector<8x1xf32>
    %c0_5 = arith.constant 0 : index
    %c24 = arith.constant 24 : index
    %18 = vector.load %arg1[%c0_5, %c24] : memref<8x456xf32, #tpu.memory_space<vmem>>, vector<8x384xf32>
    %19 = vector.broadcast %17 : vector<8x1xf32> to vector<8x384xf32>
    %20 = arith.mulf %18, %19 : vector<8x384xf32>
    %21 = arith.addf %16, %20 : vector<8x384xf32>
    %22 = vector.extract_strided_slice %0 {offsets = [0, 4], sizes = [8, 1], strides = [1, 1]} : vector<8x9xf32> to vector<8x1xf32>
    %c0_6 = arith.constant 0 : index
    %c25 = arith.constant 25 : index
    %23 = vector.load %arg1[%c0_6, %c25] : memref<8x456xf32, #tpu.memory_space<vmem>>, vector<8x384xf32>
    %24 = vector.broadcast %22 : vector<8x1xf32> to vector<8x384xf32>
    %25 = arith.mulf %23, %24 : vector<8x384xf32>
    %26 = arith.addf %21, %25 : vector<8x384xf32>
    %27 = vector.extract_strided_slice %0 {offsets = [0, 5], sizes = [8, 1], strides = [1, 1]} : vector<8x9xf32> to vector<8x1xf32>
    %c0_7 = arith.constant 0 : index
    %c26 = arith.constant 26 : index
    %28 = vector.load %arg1[%c0_7, %c26] : memref<8x456xf32, #tpu.memory_space<vmem>>, vector<8x384xf32>
    %29 = vector.broadcast %27 : vector<8x1xf32> to vector<8x384xf32>
    %30 = arith.mulf %28, %29 : vector<8x384xf32>
    %31 = arith.addf %26, %30 : vector<8x384xf32>
    %32 = vector.extract_strided_slice %0 {offsets = [0, 6], sizes = [8, 1], strides = [1, 1]} : vector<8x9xf32> to vector<8x1xf32>
    %c0_8 = arith.constant 0 : index
    %c48 = arith.constant 48 : index
    %33 = vector.load %arg1[%c0_8, %c48] : memref<8x456xf32, #tpu.memory_space<vmem>>, vector<8x384xf32>
    %34 = vector.broadcast %32 : vector<8x1xf32> to vector<8x384xf32>
    %35 = arith.mulf %33, %34 : vector<8x384xf32>
    %36 = arith.addf %31, %35 : vector<8x384xf32>
    %37 = vector.extract_strided_slice %0 {offsets = [0, 7], sizes = [8, 1], strides = [1, 1]} : vector<8x9xf32> to vector<8x1xf32>
    %c0_9 = arith.constant 0 : index
    %c49 = arith.constant 49 : index
    %38 = vector.load %arg1[%c0_9, %c49] : memref<8x456xf32, #tpu.memory_space<vmem>>, vector<8x384xf32>
    %39 = vector.broadcast %37 : vector<8x1xf32> to vector<8x384xf32>
    %40 = arith.mulf %38, %39 : vector<8x384xf32>
    %41 = arith.addf %36, %40 : vector<8x384xf32>
    %42 = vector.extract_strided_slice %0 {offsets = [0, 8], sizes = [8, 1], strides = [1, 1]} : vector<8x9xf32> to vector<8x1xf32>
    %c0_10 = arith.constant 0 : index
    %c50 = arith.constant 50 : index
    %43 = vector.load %arg1[%c0_10, %c50] : memref<8x456xf32, #tpu.memory_space<vmem>>, vector<8x384xf32>
    %44 = vector.broadcast %42 : vector<8x1xf32> to vector<8x384xf32>
    %45 = arith.mulf %43, %44 : vector<8x384xf32>
    %46 = arith.addf %41, %45 : vector<8x384xf32>
    %c0_11 = arith.constant 0 : index
    %c0_12 = arith.constant 0 : index
    %47 = vector.load %arg3[%c0_11, %c0_12] : memref<8x1xf32, #tpu.memory_space<vmem>>, vector<8x1xf32>
    %48 = vector.broadcast %47 : vector<8x1xf32> to vector<8x384xf32>
    %49 = arith.addf %46, %48 : vector<8x384xf32>
    %cst_13 = arith.constant 5.000000e-01 : f32
    %50 = vector.broadcast %cst_13 : f32 to vector<8x384xf32>
    %51 = arith.mulf %50, %49 : vector<8x384xf32>
    %cst_14 = arith.constant 0.707106769 : f32
    %52 = vector.broadcast %cst_14 : f32 to vector<8x384xf32>
    %53 = arith.mulf %49, %52 : vector<8x384xf32>
    %54 = math.absf %53 : vector<8x384xf32>
    %cst_15 = arith.constant 0.327591091 : f32
    %55 = vector.broadcast %cst_15 : f32 to vector<8x384xf32>
    %56 = arith.mulf %55, %54 : vector<8x384xf32>
    %cst_16 = arith.constant 1.000000e+00 : f32
    %57 = vector.broadcast %cst_16 : f32 to vector<8x384xf32>
    %58 = arith.addf %57, %56 : vector<8x384xf32>
    %cst_17 = arith.constant 1.000000e+00 : f32
    %59 = vector.broadcast %cst_17 : f32 to vector<8x384xf32>
    %60 = arith.divf %59, %58 : vector<8x384xf32>
    %cst_18 = arith.constant 1.06140542 : f32
    %61 = vector.broadcast %cst_18 : f32 to vector<8x384xf32>
    %62 = arith.mulf %61, %60 : vector<8x384xf32>
    %cst_19 = arith.constant -1.45315206 : f32
    %63 = vector.broadcast %cst_19 : f32 to vector<8x384xf32>
    %64 = arith.addf %62, %63 : vector<8x384xf32>
    %65 = arith.mulf %64, %60 : vector<8x384xf32>
    %cst_20 = arith.constant 1.42141378 : f32
    %66 = vector.broadcast %cst_20 : f32 to vector<8x384xf32>
    %67 = arith.addf %65, %66 : vector<8x384xf32>
    %68 = arith.mulf %67, %60 : vector<8x384xf32>
    %cst_21 = arith.constant -0.284496725 : f32
    %69 = vector.broadcast %cst_21 : f32 to vector<8x384xf32>
    %70 = arith.addf %68, %69 : vector<8x384xf32>
    %71 = arith.mulf %70, %60 : vector<8x384xf32>
    %cst_22 = arith.constant 0.254829586 : f32
    %72 = vector.broadcast %cst_22 : f32 to vector<8x384xf32>
    %73 = arith.addf %71, %72 : vector<8x384xf32>
    %74 = arith.mulf %73, %60 : vector<8x384xf32>
    %cst_23 = arith.constant 0.000000e+00 : f32
    %75 = vector.broadcast %cst_23 : f32 to vector<8x384xf32>
    %76 = arith.subf %75, %54 : vector<8x384xf32>
    %77 = arith.mulf %76, %54 : vector<8x384xf32>
    %78 = math.exp %77 : vector<8x384xf32>
    %79 = arith.mulf %74, %78 : vector<8x384xf32>
    %cst_24 = arith.constant 1.000000e+00 : f32
    %80 = vector.broadcast %cst_24 : f32 to vector<8x384xf32>
    %81 = arith.subf %80, %79 : vector<8x384xf32>
    %cst_25 = arith.constant 0.000000e+00 : f32
    %82 = vector.broadcast %cst_25 : f32 to vector<8x384xf32>
    %83 = arith.cmpf oge, %53, %82 : vector<8x384xf32>
    %cst_26 = arith.constant 0.000000e+00 : f32
    %84 = vector.broadcast %cst_26 : f32 to vector<8x384xf32>
    %85 = arith.subf %84, %81 : vector<8x384xf32>
    %86 = arith.select %83, %81, %85 : vector<8x384xi1>, vector<8x384xf32>
    %cst_27 = arith.constant 1.000000e+00 : f32
    %87 = vector.broadcast %cst_27 : f32 to vector<8x384xf32>
    %88 = arith.addf %87, %86 : vector<8x384xf32>
    %89 = arith.mulf %51, %88 : vector<8x384xf32>
    %c0_28 = arith.constant 0 : index
    %c0_29 = arith.constant 0 : index
    %90 = vector.load %arg4[%c0_28, %c0_29] : memref<8x384xf32, #tpu.memory_space<vmem>>, vector<8x384xf32>
    tpu.vector_store %arg4[%c0_28, %c0_29], %89 {strides = array<i32>} : memref<8x384xf32, #tpu.memory_space<vmem>>, vector<8x384xf32>,
    return
  }
  func.func @transform_0(%arg0: i32) -> (i32, i32) {
    %c0_i32 = arith.constant 0 : i32
    %c0_i32_0 = arith.constant 0 : i32
    return %arg0, %c0_i32 : i32, i32
  }
  func.func @transform_1(%arg0: i32) -> (i32, i32) {
    %c0_i32 = arith.constant 0 : i32
    %c0_i32_0 = arith.constant 0 : i32
    return %arg0, %c0_i32 : i32, i32
  }
  func.func @transform_2(%arg0: i32) -> (i32, i32) {
    %c0_i32 = arith.constant 0 : i32
    %c0_i32_0 = arith.constant 0 : i32
    return %arg0, %c0_i32 : i32, i32
  }
  func.func @transform_3(%arg0: i32) -> (i32, i32) {
    %c0_i32 = arith.constant 0 : i32
    %c0_i32_0 = arith.constant 0 : i32
    return %arg0, %c0_i32 : i32, i32
  }
}

module attributes {stable_mosaic.version = 11 : i64} {
  func.func @_dw_gelu_kernel(%arg0: i32, %arg1: memref<8x504xf32, #tpu.memory_space<vmem>>, %arg2: memref<8x25xf32, #tpu.memory_space<vmem>>, %arg3: memref<8x1xf32, #tpu.memory_space<vmem>>, %arg4: memref<8x384xf32, #tpu.memory_space<vmem>>) attributes {dimension_semantics = [#tpu.dimension_semantics<parallel>], iteration_bounds = array<i64: 1>, scalar_prefetch = 0 : i64, scratch_operands = 0 : i64, tpu.core_type = #tpu.core_type<tc>, window_params = [{transform_indices = @transform_0, window_bounds = array<i64: 8, 504>}, {transform_indices = @transform_1, window_bounds = array<i64: 8, 25>}, {transform_indices = @transform_2, window_bounds = array<i64: 8, 1>}, {transform_indices = @transform_3, window_bounds = array<i64: 8, 384>}]} {
    %c0 = arith.constant 0 : index
    %c0_0 = arith.constant 0 : index
    %0 = vector.load %arg2[%c0, %c0_0] : memref<8x25xf32, #tpu.memory_space<vmem>>, vector<8x25xf32>
    %cst = arith.constant 0.000000e+00 : f32
    %1 = vector.broadcast %cst : f32 to vector<8x384xf32>
    %2 = vector.extract_strided_slice %0 {offsets = [0, 0], sizes = [8, 1], strides = [1, 1]} : vector<8x25xf32> to vector<8x1xf32>
    %c0_1 = arith.constant 0 : index
    %c0_2 = arith.constant 0 : index
    %3 = vector.load %arg1[%c0_1, %c0_2] : memref<8x504xf32, #tpu.memory_space<vmem>>, vector<8x384xf32>
    %4 = vector.broadcast %2 : vector<8x1xf32> to vector<8x384xf32>
    %5 = arith.mulf %3, %4 : vector<8x384xf32>
    %6 = arith.addf %1, %5 : vector<8x384xf32>
    %7 = vector.extract_strided_slice %0 {offsets = [0, 1], sizes = [8, 1], strides = [1, 1]} : vector<8x25xf32> to vector<8x1xf32>
    %c0_3 = arith.constant 0 : index
    %c1 = arith.constant 1 : index
    %8 = vector.load %arg1[%c0_3, %c1] : memref<8x504xf32, #tpu.memory_space<vmem>>, vector<8x384xf32>
    %9 = vector.broadcast %7 : vector<8x1xf32> to vector<8x384xf32>
    %10 = arith.mulf %8, %9 : vector<8x384xf32>
    %11 = arith.addf %6, %10 : vector<8x384xf32>
    %12 = vector.extract_strided_slice %0 {offsets = [0, 2], sizes = [8, 1], strides = [1, 1]} : vector<8x25xf32> to vector<8x1xf32>
    %c0_4 = arith.constant 0 : index
    %c2 = arith.constant 2 : index
    %13 = vector.load %arg1[%c0_4, %c2] : memref<8x504xf32, #tpu.memory_space<vmem>>, vector<8x384xf32>
    %14 = vector.broadcast %12 : vector<8x1xf32> to vector<8x384xf32>
    %15 = arith.mulf %13, %14 : vector<8x384xf32>
    %16 = arith.addf %11, %15 : vector<8x384xf32>
    %17 = vector.extract_strided_slice %0 {offsets = [0, 3], sizes = [8, 1], strides = [1, 1]} : vector<8x25xf32> to vector<8x1xf32>
    %c0_5 = arith.constant 0 : index
    %c3 = arith.constant 3 : index
    %18 = vector.load %arg1[%c0_5, %c3] : memref<8x504xf32, #tpu.memory_space<vmem>>, vector<8x384xf32>
    %19 = vector.broadcast %17 : vector<8x1xf32> to vector<8x384xf32>
    %20 = arith.mulf %18, %19 : vector<8x384xf32>
    %21 = arith.addf %16, %20 : vector<8x384xf32>
    %22 = vector.extract_strided_slice %0 {offsets = [0, 4], sizes = [8, 1], strides = [1, 1]} : vector<8x25xf32> to vector<8x1xf32>
    %c0_6 = arith.constant 0 : index
    %c4 = arith.constant 4 : index
    %23 = vector.load %arg1[%c0_6, %c4] : memref<8x504xf32, #tpu.memory_space<vmem>>, vector<8x384xf32>
    %24 = vector.broadcast %22 : vector<8x1xf32> to vector<8x384xf32>
    %25 = arith.mulf %23, %24 : vector<8x384xf32>
    %26 = arith.addf %21, %25 : vector<8x384xf32>
    %27 = vector.extract_strided_slice %0 {offsets = [0, 5], sizes = [8, 1], strides = [1, 1]} : vector<8x25xf32> to vector<8x1xf32>
    %c0_7 = arith.constant 0 : index
    %c24 = arith.constant 24 : index
    %28 = vector.load %arg1[%c0_7, %c24] : memref<8x504xf32, #tpu.memory_space<vmem>>, vector<8x384xf32>
    %29 = vector.broadcast %27 : vector<8x1xf32> to vector<8x384xf32>
    %30 = arith.mulf %28, %29 : vector<8x384xf32>
    %31 = arith.addf %26, %30 : vector<8x384xf32>
    %32 = vector.extract_strided_slice %0 {offsets = [0, 6], sizes = [8, 1], strides = [1, 1]} : vector<8x25xf32> to vector<8x1xf32>
    %c0_8 = arith.constant 0 : index
    %c25 = arith.constant 25 : index
    %33 = vector.load %arg1[%c0_8, %c25] : memref<8x504xf32, #tpu.memory_space<vmem>>, vector<8x384xf32>
    %34 = vector.broadcast %32 : vector<8x1xf32> to vector<8x384xf32>
    %35 = arith.mulf %33, %34 : vector<8x384xf32>
    %36 = arith.addf %31, %35 : vector<8x384xf32>
    %37 = vector.extract_strided_slice %0 {offsets = [0, 7], sizes = [8, 1], strides = [1, 1]} : vector<8x25xf32> to vector<8x1xf32>
    %c0_9 = arith.constant 0 : index
    %c26 = arith.constant 26 : index
    %38 = vector.load %arg1[%c0_9, %c26] : memref<8x504xf32, #tpu.memory_space<vmem>>, vector<8x384xf32>
    %39 = vector.broadcast %37 : vector<8x1xf32> to vector<8x384xf32>
    %40 = arith.mulf %38, %39 : vector<8x384xf32>
    %41 = arith.addf %36, %40 : vector<8x384xf32>
    %42 = vector.extract_strided_slice %0 {offsets = [0, 8], sizes = [8, 1], strides = [1, 1]} : vector<8x25xf32> to vector<8x1xf32>
    %c0_10 = arith.constant 0 : index
    %c27 = arith.constant 27 : index
    %43 = vector.load %arg1[%c0_10, %c27] : memref<8x504xf32, #tpu.memory_space<vmem>>, vector<8x384xf32>
    %44 = vector.broadcast %42 : vector<8x1xf32> to vector<8x384xf32>
    %45 = arith.mulf %43, %44 : vector<8x384xf32>
    %46 = arith.addf %41, %45 : vector<8x384xf32>
    %47 = vector.extract_strided_slice %0 {offsets = [0, 9], sizes = [8, 1], strides = [1, 1]} : vector<8x25xf32> to vector<8x1xf32>
    %c0_11 = arith.constant 0 : index
    %c28 = arith.constant 28 : index
    %48 = vector.load %arg1[%c0_11, %c28] : memref<8x504xf32, #tpu.memory_space<vmem>>, vector<8x384xf32>
    %49 = vector.broadcast %47 : vector<8x1xf32> to vector<8x384xf32>
    %50 = arith.mulf %48, %49 : vector<8x384xf32>
    %51 = arith.addf %46, %50 : vector<8x384xf32>
    %52 = vector.extract_strided_slice %0 {offsets = [0, 10], sizes = [8, 1], strides = [1, 1]} : vector<8x25xf32> to vector<8x1xf32>
    %c0_12 = arith.constant 0 : index
    %c48 = arith.constant 48 : index
    %53 = vector.load %arg1[%c0_12, %c48] : memref<8x504xf32, #tpu.memory_space<vmem>>, vector<8x384xf32>
    %54 = vector.broadcast %52 : vector<8x1xf32> to vector<8x384xf32>
    %55 = arith.mulf %53, %54 : vector<8x384xf32>
    %56 = arith.addf %51, %55 : vector<8x384xf32>
    %57 = vector.extract_strided_slice %0 {offsets = [0, 11], sizes = [8, 1], strides = [1, 1]} : vector<8x25xf32> to vector<8x1xf32>
    %c0_13 = arith.constant 0 : index
    %c49 = arith.constant 49 : index
    %58 = vector.load %arg1[%c0_13, %c49] : memref<8x504xf32, #tpu.memory_space<vmem>>, vector<8x384xf32>
    %59 = vector.broadcast %57 : vector<8x1xf32> to vector<8x384xf32>
    %60 = arith.mulf %58, %59 : vector<8x384xf32>
    %61 = arith.addf %56, %60 : vector<8x384xf32>
    %62 = vector.extract_strided_slice %0 {offsets = [0, 12], sizes = [8, 1], strides = [1, 1]} : vector<8x25xf32> to vector<8x1xf32>
    %c0_14 = arith.constant 0 : index
    %c50 = arith.constant 50 : index
    %63 = vector.load %arg1[%c0_14, %c50] : memref<8x504xf32, #tpu.memory_space<vmem>>, vector<8x384xf32>
    %64 = vector.broadcast %62 : vector<8x1xf32> to vector<8x384xf32>
    %65 = arith.mulf %63, %64 : vector<8x384xf32>
    %66 = arith.addf %61, %65 : vector<8x384xf32>
    %67 = vector.extract_strided_slice %0 {offsets = [0, 13], sizes = [8, 1], strides = [1, 1]} : vector<8x25xf32> to vector<8x1xf32>
    %c0_15 = arith.constant 0 : index
    %c51 = arith.constant 51 : index
    %68 = vector.load %arg1[%c0_15, %c51] : memref<8x504xf32, #tpu.memory_space<vmem>>, vector<8x384xf32>
    %69 = vector.broadcast %67 : vector<8x1xf32> to vector<8x384xf32>
    %70 = arith.mulf %68, %69 : vector<8x384xf32>
    %71 = arith.addf %66, %70 : vector<8x384xf32>
    %72 = vector.extract_strided_slice %0 {offsets = [0, 14], sizes = [8, 1], strides = [1, 1]} : vector<8x25xf32> to vector<8x1xf32>
    %c0_16 = arith.constant 0 : index
    %c52 = arith.constant 52 : index
    %73 = vector.load %arg1[%c0_16, %c52] : memref<8x504xf32, #tpu.memory_space<vmem>>, vector<8x384xf32>
    %74 = vector.broadcast %72 : vector<8x1xf32> to vector<8x384xf32>
    %75 = arith.mulf %73, %74 : vector<8x384xf32>
    %76 = arith.addf %71, %75 : vector<8x384xf32>
    %77 = vector.extract_strided_slice %0 {offsets = [0, 15], sizes = [8, 1], strides = [1, 1]} : vector<8x25xf32> to vector<8x1xf32>
    %c0_17 = arith.constant 0 : index
    %c72 = arith.constant 72 : index
    %78 = vector.load %arg1[%c0_17, %c72] : memref<8x504xf32, #tpu.memory_space<vmem>>, vector<8x384xf32>
    %79 = vector.broadcast %77 : vector<8x1xf32> to vector<8x384xf32>
    %80 = arith.mulf %78, %79 : vector<8x384xf32>
    %81 = arith.addf %76, %80 : vector<8x384xf32>
    %82 = vector.extract_strided_slice %0 {offsets = [0, 16], sizes = [8, 1], strides = [1, 1]} : vector<8x25xf32> to vector<8x1xf32>
    %c0_18 = arith.constant 0 : index
    %c73 = arith.constant 73 : index
    %83 = vector.load %arg1[%c0_18, %c73] : memref<8x504xf32, #tpu.memory_space<vmem>>, vector<8x384xf32>
    %84 = vector.broadcast %82 : vector<8x1xf32> to vector<8x384xf32>
    %85 = arith.mulf %83, %84 : vector<8x384xf32>
    %86 = arith.addf %81, %85 : vector<8x384xf32>
    %87 = vector.extract_strided_slice %0 {offsets = [0, 17], sizes = [8, 1], strides = [1, 1]} : vector<8x25xf32> to vector<8x1xf32>
    %c0_19 = arith.constant 0 : index
    %c74 = arith.constant 74 : index
    %88 = vector.load %arg1[%c0_19, %c74] : memref<8x504xf32, #tpu.memory_space<vmem>>, vector<8x384xf32>
    %89 = vector.broadcast %87 : vector<8x1xf32> to vector<8x384xf32>
    %90 = arith.mulf %88, %89 : vector<8x384xf32>
    %91 = arith.addf %86, %90 : vector<8x384xf32>
    %92 = vector.extract_strided_slice %0 {offsets = [0, 18], sizes = [8, 1], strides = [1, 1]} : vector<8x25xf32> to vector<8x1xf32>
    %c0_20 = arith.constant 0 : index
    %c75 = arith.constant 75 : index
    %93 = vector.load %arg1[%c0_20, %c75] : memref<8x504xf32, #tpu.memory_space<vmem>>, vector<8x384xf32>
    %94 = vector.broadcast %92 : vector<8x1xf32> to vector<8x384xf32>
    %95 = arith.mulf %93, %94 : vector<8x384xf32>
    %96 = arith.addf %91, %95 : vector<8x384xf32>
    %97 = vector.extract_strided_slice %0 {offsets = [0, 19], sizes = [8, 1], strides = [1, 1]} : vector<8x25xf32> to vector<8x1xf32>
    %c0_21 = arith.constant 0 : index
    %c76 = arith.constant 76 : index
    %98 = vector.load %arg1[%c0_21, %c76] : memref<8x504xf32, #tpu.memory_space<vmem>>, vector<8x384xf32>
    %99 = vector.broadcast %97 : vector<8x1xf32> to vector<8x384xf32>
    %100 = arith.mulf %98, %99 : vector<8x384xf32>
    %101 = arith.addf %96, %100 : vector<8x384xf32>
    %102 = vector.extract_strided_slice %0 {offsets = [0, 20], sizes = [8, 1], strides = [1, 1]} : vector<8x25xf32> to vector<8x1xf32>
    %c0_22 = arith.constant 0 : index
    %c96 = arith.constant 96 : index
    %103 = vector.load %arg1[%c0_22, %c96] : memref<8x504xf32, #tpu.memory_space<vmem>>, vector<8x384xf32>
    %104 = vector.broadcast %102 : vector<8x1xf32> to vector<8x384xf32>
    %105 = arith.mulf %103, %104 : vector<8x384xf32>
    %106 = arith.addf %101, %105 : vector<8x384xf32>
    %107 = vector.extract_strided_slice %0 {offsets = [0, 21], sizes = [8, 1], strides = [1, 1]} : vector<8x25xf32> to vector<8x1xf32>
    %c0_23 = arith.constant 0 : index
    %c97 = arith.constant 97 : index
    %108 = vector.load %arg1[%c0_23, %c97] : memref<8x504xf32, #tpu.memory_space<vmem>>, vector<8x384xf32>
    %109 = vector.broadcast %107 : vector<8x1xf32> to vector<8x384xf32>
    %110 = arith.mulf %108, %109 : vector<8x384xf32>
    %111 = arith.addf %106, %110 : vector<8x384xf32>
    %112 = vector.extract_strided_slice %0 {offsets = [0, 22], sizes = [8, 1], strides = [1, 1]} : vector<8x25xf32> to vector<8x1xf32>
    %c0_24 = arith.constant 0 : index
    %c98 = arith.constant 98 : index
    %113 = vector.load %arg1[%c0_24, %c98] : memref<8x504xf32, #tpu.memory_space<vmem>>, vector<8x384xf32>
    %114 = vector.broadcast %112 : vector<8x1xf32> to vector<8x384xf32>
    %115 = arith.mulf %113, %114 : vector<8x384xf32>
    %116 = arith.addf %111, %115 : vector<8x384xf32>
    %117 = vector.extract_strided_slice %0 {offsets = [0, 23], sizes = [8, 1], strides = [1, 1]} : vector<8x25xf32> to vector<8x1xf32>
    %c0_25 = arith.constant 0 : index
    %c99 = arith.constant 99 : index
    %118 = vector.load %arg1[%c0_25, %c99] : memref<8x504xf32, #tpu.memory_space<vmem>>, vector<8x384xf32>
    %119 = vector.broadcast %117 : vector<8x1xf32> to vector<8x384xf32>
    %120 = arith.mulf %118, %119 : vector<8x384xf32>
    %121 = arith.addf %116, %120 : vector<8x384xf32>
    %122 = vector.extract_strided_slice %0 {offsets = [0, 24], sizes = [8, 1], strides = [1, 1]} : vector<8x25xf32> to vector<8x1xf32>
    %c0_26 = arith.constant 0 : index
    %c100 = arith.constant 100 : index
    %123 = vector.load %arg1[%c0_26, %c100] : memref<8x504xf32, #tpu.memory_space<vmem>>, vector<8x384xf32>
    %124 = vector.broadcast %122 : vector<8x1xf32> to vector<8x384xf32>
    %125 = arith.mulf %123, %124 : vector<8x384xf32>
    %126 = arith.addf %121, %125 : vector<8x384xf32>
    %c0_27 = arith.constant 0 : index
    %c0_28 = arith.constant 0 : index
    %127 = vector.load %arg3[%c0_27, %c0_28] : memref<8x1xf32, #tpu.memory_space<vmem>>, vector<8x1xf32>
    %128 = vector.broadcast %127 : vector<8x1xf32> to vector<8x384xf32>
    %129 = arith.addf %126, %128 : vector<8x384xf32>
    %cst_29 = arith.constant 5.000000e-01 : f32
    %130 = vector.broadcast %cst_29 : f32 to vector<8x384xf32>
    %131 = arith.mulf %130, %129 : vector<8x384xf32>
    %cst_30 = arith.constant 0.707106769 : f32
    %132 = vector.broadcast %cst_30 : f32 to vector<8x384xf32>
    %133 = arith.mulf %129, %132 : vector<8x384xf32>
    %134 = math.absf %133 : vector<8x384xf32>
    %cst_31 = arith.constant 0.327591091 : f32
    %135 = vector.broadcast %cst_31 : f32 to vector<8x384xf32>
    %136 = arith.mulf %135, %134 : vector<8x384xf32>
    %cst_32 = arith.constant 1.000000e+00 : f32
    %137 = vector.broadcast %cst_32 : f32 to vector<8x384xf32>
    %138 = arith.addf %137, %136 : vector<8x384xf32>
    %cst_33 = arith.constant 1.000000e+00 : f32
    %139 = vector.broadcast %cst_33 : f32 to vector<8x384xf32>
    %140 = arith.divf %139, %138 : vector<8x384xf32>
    %cst_34 = arith.constant 1.06140542 : f32
    %141 = vector.broadcast %cst_34 : f32 to vector<8x384xf32>
    %142 = arith.mulf %141, %140 : vector<8x384xf32>
    %cst_35 = arith.constant -1.45315206 : f32
    %143 = vector.broadcast %cst_35 : f32 to vector<8x384xf32>
    %144 = arith.addf %142, %143 : vector<8x384xf32>
    %145 = arith.mulf %144, %140 : vector<8x384xf32>
    %cst_36 = arith.constant 1.42141378 : f32
    %146 = vector.broadcast %cst_36 : f32 to vector<8x384xf32>
    %147 = arith.addf %145, %146 : vector<8x384xf32>
    %148 = arith.mulf %147, %140 : vector<8x384xf32>
    %cst_37 = arith.constant -0.284496725 : f32
    %149 = vector.broadcast %cst_37 : f32 to vector<8x384xf32>
    %150 = arith.addf %148, %149 : vector<8x384xf32>
    %151 = arith.mulf %150, %140 : vector<8x384xf32>
    %cst_38 = arith.constant 0.254829586 : f32
    %152 = vector.broadcast %cst_38 : f32 to vector<8x384xf32>
    %153 = arith.addf %151, %152 : vector<8x384xf32>
    %154 = arith.mulf %153, %140 : vector<8x384xf32>
    %cst_39 = arith.constant 0.000000e+00 : f32
    %155 = vector.broadcast %cst_39 : f32 to vector<8x384xf32>
    %156 = arith.subf %155, %134 : vector<8x384xf32>
    %157 = arith.mulf %156, %134 : vector<8x384xf32>
    %158 = math.exp %157 : vector<8x384xf32>
    %159 = arith.mulf %154, %158 : vector<8x384xf32>
    %cst_40 = arith.constant 1.000000e+00 : f32
    %160 = vector.broadcast %cst_40 : f32 to vector<8x384xf32>
    %161 = arith.subf %160, %159 : vector<8x384xf32>
    %cst_41 = arith.constant 0.000000e+00 : f32
    %162 = vector.broadcast %cst_41 : f32 to vector<8x384xf32>
    %163 = arith.cmpf oge, %133, %162 : vector<8x384xf32>
    %cst_42 = arith.constant 0.000000e+00 : f32
    %164 = vector.broadcast %cst_42 : f32 to vector<8x384xf32>
    %165 = arith.subf %164, %161 : vector<8x384xf32>
    %166 = arith.select %163, %161, %165 : vector<8x384xi1>, vector<8x384xf32>
    %cst_43 = arith.constant 1.000000e+00 : f32
    %167 = vector.broadcast %cst_43 : f32 to vector<8x384xf32>
    %168 = arith.addf %167, %166 : vector<8x384xf32>
    %169 = arith.mulf %131, %168 : vector<8x384xf32>
    %c0_44 = arith.constant 0 : index
    %c0_45 = arith.constant 0 : index
    %170 = vector.load %arg4[%c0_44, %c0_45] : memref<8x384xf32, #tpu.memory_space<vmem>>, vector<8x384xf32>
    tpu.vector_store %arg4[%c0_44, %c0_45], %169 {strides = array<i32>} : memref<8x384xf32, #tpu.memory_space<vmem>>, vector<8x384xf32>,
    return
  }
  func.func @transform_0(%arg0: i32) -> (i32, i32) {
    %c0_i32 = arith.constant 0 : i32
    %c0_i32_0 = arith.constant 0 : i32
    return %arg0, %c0_i32 : i32, i32
  }
  func.func @transform_1(%arg0: i32) -> (i32, i32) {
    %c0_i32 = arith.constant 0 : i32
    %c0_i32_0 = arith.constant 0 : i32
    return %arg0, %c0_i32 : i32, i32
  }
  func.func @transform_2(%arg0: i32) -> (i32, i32) {
    %c0_i32 = arith.constant 0 : i32
    %c0_i32_0 = arith.constant 0 : i32
    return %arg0, %c0_i32 : i32, i32
  }
  func.func @transform_3(%arg0: i32) -> (i32, i32) {
    %c0_i32 = arith.constant 0 : i32
    %c0_i32_0 = arith.constant 0 : i32
    return %arg0, %c0_i32 : i32, i32
  }
}

module attributes {stable_mosaic.version = 11 : i64} {
  func.func @_mix_norm_kernel(%arg0: i32, %arg1: i32, %arg2: memref<1x16x256xbf16, #tpu.memory_space<vmem>>, %arg3: memref<16x16xbf16, #tpu.memory_space<vmem>>, %arg4: memref<16x1xf32, #tpu.memory_space<vmem>>, %arg5: memref<16x1xf32, #tpu.memory_space<vmem>>, %arg6: memref<1x16x256xf32, #tpu.memory_space<vmem>>) attributes {dimension_semantics = [#tpu.dimension_semantics<parallel>, #tpu.dimension_semantics<parallel>], iteration_bounds = array<i64: 2, 1>, scalar_prefetch = 0 : i64, scratch_operands = 0 : i64, tpu.core_type = #tpu.core_type<tc>, window_params = [{transform_indices = @transform_0, window_bounds = array<i64: 1, 16, 256>}, {pipeline_mode = #tpu.pipeline_mode<synchronous>, transform_indices = @transform_1, window_bounds = array<i64: 16, 16>}, {pipeline_mode = #tpu.pipeline_mode<synchronous>, transform_indices = @transform_2, window_bounds = array<i64: 16, 1>}, {pipeline_mode = #tpu.pipeline_mode<synchronous>, transform_indices = @transform_3, window_bounds = array<i64: 16, 1>}, {transform_indices = @transform_4, window_bounds = array<i64: 1, 16, 256>}]} {
    %c0 = arith.constant 0 : index
    %c0_0 = arith.constant 0 : index
    %0 = vector.load %arg3[%c0, %c0_0] : memref<16x16xbf16, #tpu.memory_space<vmem>>, vector<16x16xbf16>
    %c0_1 = arith.constant 0 : index
    %c0_2 = arith.constant 0 : index
    %c0_3 = arith.constant 0 : index
    %1 = vector.load %arg2[%c0_1, %c0_2, %c0_3] : memref<1x16x256xbf16, #tpu.memory_space<vmem>>, vector<1x16x256xbf16>
    %2 = vector.shape_cast %1 : vector<1x16x256xbf16> to vector<16x256xbf16>
    %cst = arith.constant dense<0.000000e+00> : vector<16x256xf32>
    %3 = tpu.matmul %0, %2, %cst {dimension_numbers = #tpu.dot_dimension_numbers<[1], [0], [0], [1], [0, 0, 1, 1], [], []>} : vector<16x16xbf16>, vector<16x256xbf16>, vector<16x256xf32> -> vector<16x256xf32>
    %c0_4 = arith.constant 0 : index
    %c0_5 = arith.constant 0 : index
    %4 = vector.load %arg4[%c0_4, %c0_5] : memref<16x1xf32, #tpu.memory_space<vmem>>, vector<16x1xf32>
    %5 = vector.broadcast %4 : vector<16x1xf32> to vector<16x256xf32>
    %6 = arith.mulf %3, %5 : vector<16x256xf32>
    %c0_6 = arith.constant 0 : index
    %c0_7 = arith.constant 0 : index
    %7 = vector.load %arg5[%c0_6, %c0_7] : memref<16x1xf32, #tpu.memory_space<vmem>>, vector<16x1xf32>
    %8 = vector.broadcast %7 : vector<16x1xf32> to vector<16x256xf32>
    %9 = arith.addf %6, %8 : vector<16x256xf32>
    %cst_8 = arith.constant 0.000000e+00 : f32
    %10 = vector.broadcast %cst_8 : f32 to vector<16x256xf32>
    %11 = arith.maximumf %9, %10 : vector<16x256xf32>
    %c0_9 = arith.constant 0 : index
    %c0_10 = arith.constant 0 : index
    %c0_11 = arith.constant 0 : index
    %12 = vector.load %arg6[%c0_9, %c0_10, %c0_11] : memref<1x16x256xf32, #tpu.memory_space<vmem>>, vector<1x16x256xf32>
    %13 = vector.shape_cast %12 : vector<1x16x256xf32> to vector<16x256xf32>
    %14 = vector.shape_cast %11 : vector<16x256xf32> to vector<1x16x256xf32>
    tpu.vector_store %arg6[%c0_9, %c0_10, %c0_11], %14 {strides = array<i32>} : memref<1x16x256xf32, #tpu.memory_space<vmem>>, vector<1x16x256xf32>,
    return
  }
  func.func @transform_0(%arg0: i32, %arg1: i32) -> (i32, i32, i32) {
    %c0_i32 = arith.constant 0 : i32
    %c0_i32_0 = arith.constant 0 : i32
    return %arg0, %c0_i32, %arg1 : i32, i32, i32
  }
  func.func @transform_1(%arg0: i32, %arg1: i32) -> (i32, i32) {
    %c0_i32 = arith.constant 0 : i32
    %c0_i32_0 = arith.constant 0 : i32
    %c0_i32_1 = arith.constant 0 : i32
    return %c0_i32, %c0_i32_0 : i32, i32
  }
  func.func @transform_2(%arg0: i32, %arg1: i32) -> (i32, i32) {
    %c0_i32 = arith.constant 0 : i32
    %c0_i32_0 = arith.constant 0 : i32
    %c0_i32_1 = arith.constant 0 : i32
    return %c0_i32, %c0_i32_0 : i32, i32
  }
  func.func @transform_3(%arg0: i32, %arg1: i32) -> (i32, i32) {
    %c0_i32 = arith.constant 0 : i32
    %c0_i32_0 = arith.constant 0 : i32
    %c0_i32_1 = arith.constant 0 : i32
    return %c0_i32, %c0_i32_0 : i32, i32
  }
  func.func @transform_4(%arg0: i32, %arg1: i32) -> (i32, i32, i32) {
    %c0_i32 = arith.constant 0 : i32
    %c0_i32_0 = arith.constant 0 : i32
    return %arg0, %c0_i32, %arg1 : i32, i32, i32
  }
}

module attributes {stable_mosaic.version = 11 : i64} {
  func.func @_mix_stats_kernel(%arg0: i32, %arg1: i32, %arg2: memref<1x16x256xbf16, #tpu.memory_space<vmem>>, %arg3: memref<16x16xbf16, #tpu.memory_space<vmem>>, %arg4: memref<1x16x1xf32, #tpu.memory_space<vmem>>, %arg5: memref<1x16x1xf32, #tpu.memory_space<vmem>>) attributes {dimension_semantics = [#tpu.dimension_semantics<parallel>, #tpu.dimension_semantics<parallel>], iteration_bounds = array<i64: 2, 1>, scalar_prefetch = 0 : i64, scratch_operands = 0 : i64, tpu.core_type = #tpu.core_type<tc>, window_params = [{transform_indices = @transform_0, window_bounds = array<i64: 1, 16, 256>}, {pipeline_mode = #tpu.pipeline_mode<synchronous>, transform_indices = @transform_1, window_bounds = array<i64: 16, 16>}, {transform_indices = @transform_2, window_bounds = array<i64: 1, 16, 1>}, {transform_indices = @transform_3, window_bounds = array<i64: 1, 16, 1>}]} {
    %c0 = arith.constant 0 : index
    %c0_0 = arith.constant 0 : index
    %0 = vector.load %arg3[%c0, %c0_0] : memref<16x16xbf16, #tpu.memory_space<vmem>>, vector<16x16xbf16>
    %c0_1 = arith.constant 0 : index
    %c0_2 = arith.constant 0 : index
    %c0_3 = arith.constant 0 : index
    %1 = vector.load %arg2[%c0_1, %c0_2, %c0_3] : memref<1x16x256xbf16, #tpu.memory_space<vmem>>, vector<1x16x256xbf16>
    %2 = vector.shape_cast %1 : vector<1x16x256xbf16> to vector<16x256xbf16>
    %cst = arith.constant dense<0.000000e+00> : vector<16x256xf32>
    %3 = tpu.matmul %0, %2, %cst {dimension_numbers = #tpu.dot_dimension_numbers<[1], [0], [0], [1], [0, 0, 1, 1], [], []>} : vector<16x16xbf16>, vector<16x256xbf16>, vector<16x256xf32> -> vector<16x256xf32>
    %cst_4 = arith.constant dense<0.000000e+00> : vector<16xf32>
    %4 = vector.multi_reduction <add>, %3, %cst_4 [1] : vector<16x256xf32> to vector<16xf32>
    %5 = vector.shape_cast %4 : vector<16xf32> to vector<16x1xf32>
    %c0_5 = arith.constant 0 : index
    %c0_6 = arith.constant 0 : index
    %c0_7 = arith.constant 0 : index
    %6 = vector.load %arg4[%c0_5, %c0_6, %c0_7] : memref<1x16x1xf32, #tpu.memory_space<vmem>>, vector<1x16x1xf32>
    %7 = vector.shape_cast %6 : vector<1x16x1xf32> to vector<16x1xf32>
    %8 = vector.shape_cast %5 : vector<16x1xf32> to vector<1x16x1xf32>
    tpu.vector_store %arg4[%c0_5, %c0_6, %c0_7], %8 {strides = array<i32>} : memref<1x16x1xf32, #tpu.memory_space<vmem>>, vector<1x16x1xf32>,
    %9 = arith.mulf %3, %3 : vector<16x256xf32>
    %cst_8 = arith.constant dense<0.000000e+00> : vector<16xf32>
    %10 = vector.multi_reduction <add>, %9, %cst_8 [1] : vector<16x256xf32> to vector<16xf32>
    %11 = vector.shape_cast %10 : vector<16xf32> to vector<16x1xf32>
    %c0_9 = arith.constant 0 : index
    %c0_10 = arith.constant 0 : index
    %c0_11 = arith.constant 0 : index
    %12 = vector.load %arg5[%c0_9, %c0_10, %c0_11] : memref<1x16x1xf32, #tpu.memory_space<vmem>>, vector<1x16x1xf32>
    %13 = vector.shape_cast %12 : vector<1x16x1xf32> to vector<16x1xf32>
    %14 = vector.shape_cast %11 : vector<16x1xf32> to vector<1x16x1xf32>
    tpu.vector_store %arg5[%c0_9, %c0_10, %c0_11], %14 {strides = array<i32>} : memref<1x16x1xf32, #tpu.memory_space<vmem>>, vector<1x16x1xf32>,
    return
  }
  func.func @transform_0(%arg0: i32, %arg1: i32) -> (i32, i32, i32) {
    %c0_i32 = arith.constant 0 : i32
    %c0_i32_0 = arith.constant 0 : i32
    return %arg0, %c0_i32, %arg1 : i32, i32, i32
  }
  func.func @transform_1(%arg0: i32, %arg1: i32) -> (i32, i32) {
    %c0_i32 = arith.constant 0 : i32
    %c0_i32_0 = arith.constant 0 : i32
    %c0_i32_1 = arith.constant 0 : i32
    return %c0_i32, %c0_i32_0 : i32, i32
  }
  func.func @transform_2(%arg0: i32, %arg1: i32) -> (i32, i32, i32) {
    %c1_i32 = arith.constant 1 : i32
    %0 = arith.muli %arg0, %c1_i32 : i32
    %1 = arith.addi %0, %arg1 : i32
    %c0_i32 = arith.constant 0 : i32
    %c0_i32_0 = arith.constant 0 : i32
    %c0_i32_1 = arith.constant 0 : i32
    return %1, %c0_i32, %c0_i32_0 : i32, i32, i32
  }
  func.func @transform_3(%arg0: i32, %arg1: i32) -> (i32, i32, i32) {
    %c1_i32 = arith.constant 1 : i32
    %0 = arith.muli %arg0, %c1_i32 : i32
    %1 = arith.addi %0, %arg1 : i32
    %c0_i32 = arith.constant 0 : i32
    %c0_i32_0 = arith.constant 0 : i32
    %c0_i32_1 = arith.constant 0 : i32
    return %1, %c0_i32, %c0_i32_0 : i32, i32, i32
  }
}

module attributes {stable_mosaic.version = 11 : i64} {
  func.func @_add_stats_kernel(%arg0: i32, %arg1: i32, %arg2: memref<1x8x256xf32, #tpu.memory_space<vmem>>, %arg3: memref<1x8x256xf32, #tpu.memory_space<vmem>>, %arg4: memref<1x8x1xf32, #tpu.memory_space<vmem>>, %arg5: memref<1x8x1xf32, #tpu.memory_space<vmem>>) attributes {dimension_semantics = [#tpu.dimension_semantics<parallel>, #tpu.dimension_semantics<parallel>], iteration_bounds = array<i64: 2, 1>, scalar_prefetch = 0 : i64, scratch_operands = 0 : i64, tpu.core_type = #tpu.core_type<tc>, window_params = [{transform_indices = @transform_0, window_bounds = array<i64: 1, 8, 256>}, {transform_indices = @transform_1, window_bounds = array<i64: 1, 8, 256>}, {transform_indices = @transform_2, window_bounds = array<i64: 1, 8, 1>}, {transform_indices = @transform_3, window_bounds = array<i64: 1, 8, 1>}]} {
    %c0 = arith.constant 0 : index
    %c0_0 = arith.constant 0 : index
    %c0_1 = arith.constant 0 : index
    %0 = vector.load %arg2[%c0, %c0_0, %c0_1] : memref<1x8x256xf32, #tpu.memory_space<vmem>>, vector<1x8x256xf32>
    %1 = vector.shape_cast %0 : vector<1x8x256xf32> to vector<8x256xf32>
    %c0_2 = arith.constant 0 : index
    %c0_3 = arith.constant 0 : index
    %c0_4 = arith.constant 0 : index
    %2 = vector.load %arg3[%c0_2, %c0_3, %c0_4] : memref<1x8x256xf32, #tpu.memory_space<vmem>>, vector<1x8x256xf32>
    %3 = vector.shape_cast %2 : vector<1x8x256xf32> to vector<8x256xf32>
    %4 = arith.addf %1, %3 : vector<8x256xf32>
    %cst = arith.constant dense<0.000000e+00> : vector<8xf32>
    %5 = vector.multi_reduction <add>, %4, %cst [1] : vector<8x256xf32> to vector<8xf32>
    %6 = vector.shape_cast %5 : vector<8xf32> to vector<8x1xf32>
    %c0_5 = arith.constant 0 : index
    %c0_6 = arith.constant 0 : index
    %c0_7 = arith.constant 0 : index
    %7 = vector.load %arg4[%c0_5, %c0_6, %c0_7] : memref<1x8x1xf32, #tpu.memory_space<vmem>>, vector<1x8x1xf32>
    %8 = vector.shape_cast %7 : vector<1x8x1xf32> to vector<8x1xf32>
    %9 = vector.shape_cast %6 : vector<8x1xf32> to vector<1x8x1xf32>
    tpu.vector_store %arg4[%c0_5, %c0_6, %c0_7], %9 {strides = array<i32>} : memref<1x8x1xf32, #tpu.memory_space<vmem>>, vector<1x8x1xf32>,
    %10 = arith.mulf %4, %4 : vector<8x256xf32>
    %cst_8 = arith.constant dense<0.000000e+00> : vector<8xf32>
    %11 = vector.multi_reduction <add>, %10, %cst_8 [1] : vector<8x256xf32> to vector<8xf32>
    %12 = vector.shape_cast %11 : vector<8xf32> to vector<8x1xf32>
    %c0_9 = arith.constant 0 : index
    %c0_10 = arith.constant 0 : index
    %c0_11 = arith.constant 0 : index
    %13 = vector.load %arg5[%c0_9, %c0_10, %c0_11] : memref<1x8x1xf32, #tpu.memory_space<vmem>>, vector<1x8x1xf32>
    %14 = vector.shape_cast %13 : vector<1x8x1xf32> to vector<8x1xf32>
    %15 = vector.shape_cast %12 : vector<8x1xf32> to vector<1x8x1xf32>
    tpu.vector_store %arg5[%c0_9, %c0_10, %c0_11], %15 {strides = array<i32>} : memref<1x8x1xf32, #tpu.memory_space<vmem>>, vector<1x8x1xf32>,
    return
  }
  func.func @transform_0(%arg0: i32, %arg1: i32) -> (i32, i32, i32) {
    %c0_i32 = arith.constant 0 : i32
    %c0_i32_0 = arith.constant 0 : i32
    return %arg0, %c0_i32, %arg1 : i32, i32, i32
  }
  func.func @transform_1(%arg0: i32, %arg1: i32) -> (i32, i32, i32) {
    %c0_i32 = arith.constant 0 : i32
    %c0_i32_0 = arith.constant 0 : i32
    return %arg0, %c0_i32, %arg1 : i32, i32, i32
  }
  func.func @transform_2(%arg0: i32, %arg1: i32) -> (i32, i32, i32) {
    %c1_i32 = arith.constant 1 : i32
    %0 = arith.muli %arg0, %c1_i32 : i32
    %1 = arith.addi %0, %arg1 : i32
    %c0_i32 = arith.constant 0 : i32
    %c0_i32_0 = arith.constant 0 : i32
    %c0_i32_1 = arith.constant 0 : i32
    return %1, %c0_i32, %c0_i32_0 : i32, i32, i32
  }
  func.func @transform_3(%arg0: i32, %arg1: i32) -> (i32, i32, i32) {
    %c1_i32 = arith.constant 1 : i32
    %0 = arith.muli %arg0, %c1_i32 : i32
    %1 = arith.addi %0, %arg1 : i32
    %c0_i32 = arith.constant 0 : i32
    %c0_i32_0 = arith.constant 0 : i32
    %c0_i32_1 = arith.constant 0 : i32
    return %1, %c0_i32, %c0_i32_0 : i32, i32, i32
  }
}

module attributes {stable_mosaic.version = 11 : i64} {
  func.func @_add_norm_kernel(%arg0: i32, %arg1: i32, %arg2: memref<1x8x256xf32, #tpu.memory_space<vmem>>, %arg3: memref<1x8x256xf32, #tpu.memory_space<vmem>>, %arg4: memref<8x1xf32, #tpu.memory_space<vmem>>, %arg5: memref<8x1xf32, #tpu.memory_space<vmem>>, %arg6: memref<1x8x256xf32, #tpu.memory_space<vmem>>) attributes {dimension_semantics = [#tpu.dimension_semantics<parallel>, #tpu.dimension_semantics<parallel>], iteration_bounds = array<i64: 2, 1>, scalar_prefetch = 0 : i64, scratch_operands = 0 : i64, tpu.core_type = #tpu.core_type<tc>, window_params = [{transform_indices = @transform_0, window_bounds = array<i64: 1, 8, 256>}, {transform_indices = @transform_1, window_bounds = array<i64: 1, 8, 256>}, {pipeline_mode = #tpu.pipeline_mode<synchronous>, transform_indices = @transform_2, window_bounds = array<i64: 8, 1>}, {pipeline_mode = #tpu.pipeline_mode<synchronous>, transform_indices = @transform_3, window_bounds = array<i64: 8, 1>}, {transform_indices = @transform_4, window_bounds = array<i64: 1, 8, 256>}]} {
    %c0 = arith.constant 0 : index
    %c0_0 = arith.constant 0 : index
    %c0_1 = arith.constant 0 : index
    %0 = vector.load %arg2[%c0, %c0_0, %c0_1] : memref<1x8x256xf32, #tpu.memory_space<vmem>>, vector<1x8x256xf32>
    %1 = vector.shape_cast %0 : vector<1x8x256xf32> to vector<8x256xf32>
    %c0_2 = arith.constant 0 : index
    %c0_3 = arith.constant 0 : index
    %c0_4 = arith.constant 0 : index
    %2 = vector.load %arg3[%c0_2, %c0_3, %c0_4] : memref<1x8x256xf32, #tpu.memory_space<vmem>>, vector<1x8x256xf32>
    %3 = vector.shape_cast %2 : vector<1x8x256xf32> to vector<8x256xf32>
    %4 = arith.addf %1, %3 : vector<8x256xf32>
    %c0_5 = arith.constant 0 : index
    %c0_6 = arith.constant 0 : index
    %5 = vector.load %arg4[%c0_5, %c0_6] : memref<8x1xf32, #tpu.memory_space<vmem>>, vector<8x1xf32>
    %6 = vector.broadcast %5 : vector<8x1xf32> to vector<8x256xf32>
    %7 = arith.mulf %4, %6 : vector<8x256xf32>
    %c0_7 = arith.constant 0 : index
    %c0_8 = arith.constant 0 : index
    %8 = vector.load %arg5[%c0_7, %c0_8] : memref<8x1xf32, #tpu.memory_space<vmem>>, vector<8x1xf32>
    %9 = vector.broadcast %8 : vector<8x1xf32> to vector<8x256xf32>
    %10 = arith.addf %7, %9 : vector<8x256xf32>
    %cst = arith.constant 0.000000e+00 : f32
    %11 = vector.broadcast %cst : f32 to vector<8x256xf32>
    %12 = arith.maximumf %10, %11 : vector<8x256xf32>
    %c0_9 = arith.constant 0 : index
    %c0_10 = arith.constant 0 : index
    %c0_11 = arith.constant 0 : index
    %13 = vector.load %arg6[%c0_9, %c0_10, %c0_11] : memref<1x8x256xf32, #tpu.memory_space<vmem>>, vector<1x8x256xf32>
    %14 = vector.shape_cast %13 : vector<1x8x256xf32> to vector<8x256xf32>
    %15 = vector.shape_cast %12 : vector<8x256xf32> to vector<1x8x256xf32>
    tpu.vector_store %arg6[%c0_9, %c0_10, %c0_11], %15 {strides = array<i32>} : memref<1x8x256xf32, #tpu.memory_space<vmem>>, vector<1x8x256xf32>,
    return
  }
  func.func @transform_0(%arg0: i32, %arg1: i32) -> (i32, i32, i32) {
    %c0_i32 = arith.constant 0 : i32
    %c0_i32_0 = arith.constant 0 : i32
    return %arg0, %c0_i32, %arg1 : i32, i32, i32
  }
  func.func @transform_1(%arg0: i32, %arg1: i32) -> (i32, i32, i32) {
    %c0_i32 = arith.constant 0 : i32
    %c0_i32_0 = arith.constant 0 : i32
    return %arg0, %c0_i32, %arg1 : i32, i32, i32
  }
  func.func @transform_2(%arg0: i32, %arg1: i32) -> (i32, i32) {
    %c0_i32 = arith.constant 0 : i32
    %c0_i32_0 = arith.constant 0 : i32
    %c0_i32_1 = arith.constant 0 : i32
    return %c0_i32, %c0_i32_0 : i32, i32
  }
  func.func @transform_3(%arg0: i32, %arg1: i32) -> (i32, i32) {
    %c0_i32 = arith.constant 0 : i32
    %c0_i32_0 = arith.constant 0 : i32
    %c0_i32_1 = arith.constant 0 : i32
    return %c0_i32, %c0_i32_0 : i32, i32
  }
  func.func @transform_4(%arg0: i32, %arg1: i32) -> (i32, i32, i32) {
    %c0_i32 = arith.constant 0 : i32
    %c0_i32_0 = arith.constant 0 : i32
    return %arg0, %c0_i32, %arg1 : i32, i32, i32
  }
}

</mosaic_0001>

<bundles_post_ra>
// kernel: tile.1
= control target key start
LH: loop header
LB: loop body
LE: loop exit
PB: predicated region body
PF: predicated region fallthrough
CT: control target
= control target key end

     0   :  { %s35_s8 = smov 125   ;;  %vm8_vm0 = vcmask 7168   ;;  %s36_s11 = smov 126   ;;  %s62_s0 = inlined_call_operand.vmem [shape: f32[2,4], index: 0, kind: input, shape index: {}]   ;;  %s63_s1 = inlined_call_operand.vmem [shape: f32[8,1], index: 1, kind: output, shape index: {}]  }
   0x1   :  { %v5_v0 = vld [vmem:[%s62_s0] sm:$0x3]  ;;  %s34_s0 = smov 127  }
   0x2   :  { %6 = vst [vmem:[#allocation0] sm:$0x3] %v5_v0 }
   0x9   :  { %v10_v1 = vld [vmem:[#allocation0] sm:$0x3]  }
   0xa   :  { %v22_v2 = vld [vmem:[#allocation0] sm:$0x3]   ;;  %11 = vrot.lane.b32.xlu0 %v10_v1, %s34_s0 }
   0xb   :  { %23 = vrot.lane.b32.xlu1 %v22_v2, %s35_s8  ;;  %v7_v3 = vld [vmem:[#allocation0] sm:$0x3]  }
   0xc   :  { %v16_v4 = vld [vmem:[#allocation0] sm:$0x3]   ;;  %9 = vst.msk [vmem:[%s63_s1] ss:$4 sm:$0x3] %vm8_vm0, %v7_v3  }
   0xe   :  { %17 = vrot.lane.b32.xlu0 %v16_v4, %s36_s11 }
  0x7c   :  { %v12_v5 = vpop.permute.xlu0 %11  }
  0x7d   :  { %v24_v6 = vpop.permute.xlu1 %23   ;;  %28 = vst.msk [vmem:[%s63_s1 + $0x1] ss:$4 sm:$0x3] %vm8_vm0, %v12_v5  }
  0x7e   :  { %30 = vst.msk [vmem:[%s63_s1 + $0x3] ss:$4 sm:$0x3] %vm8_vm0, %v24_v6  }
  0x80   :  { %v18_v7 = vpop.permute.xlu0 %17  }
  0x81   :  { %29 = vst.msk [vmem:[%s63_s1 + $0x2] ss:$4 sm:$0x3] %vm8_vm0, %v18_v7  }

// kernel: tile.34
= control target key start
LH: loop header
LB: loop body
LE: loop exit
PB: predicated region body
PF: predicated region fallthrough
CT: control target
= control target key end

     0   :  { %s22_s0 = inlined_call_operand.vmem [shape: f32[4], index: 0, kind: input, shape index: {}]   ;;  %s23_s1 = inlined_call_operand.vmem [shape: f32[2,4], index: 1, kind: output, shape index: {}]  }
   0x1   :  { %v4_v0 = vld [vmem:[%s22_s0] ss:$0 sm:$0xff] }
   0x2   :  { %5 = vst [vmem:[%s23_s1] sm:$0x3] %v4_v0 }

// kernel: tile.25
= control target key start
LH: loop header
LB: loop body
LE: loop exit
PB: predicated region body
PF: predicated region fallthrough
CT: control target
= control target key end

     0   :  { %2 = vsyncpa [#allocation1], 0  ;;  %s42_s6 = smov [#allocation0]   ;;  %s59_s0 = inlined_call_operand.hbm [shape: f32[4], index: 0, kind: input, shape index: {}]   ;;  %s60_s1 = inlined_call_operand.vmem [shape: f32[2,4], index: 1, kind: output, shape index: {}]  }
   0x1   :  { %s9_s7 = sshll.u32 %s42_s6, 4  ;;  %s10_s7 = int_to_ptr.vmem [resolvable:$true] %s9_s7 }
   0x2   :  { %s28_s8 = scalar_lea.vmem %s10_s7, 16  ;;  %s32_s9 = scalar_lea.vmem %s10_s7, 32 }
   0x3   :  { %p29_p0 = scmp.ne.s32.totalorder %s10_s7, %s28_s8  ;;  %p33_p1 = scmp.lt.s32.totalorder %s10_s7, %s10_s7 }
   0x4   :  { %p34_p2 = scmp.lt.s32.totalorder %s32_s9, %s28_s8 }
   0x6   :  { %p35_p3 = por %p34_p2, %p33_p1 }
   0x8   :  { %p36_p4 = pnand %p35_p3, %p29_p0 }
   0xa   :  { %39 = shalt.err (!%p36_p4)
}
   0xb   :  { %12 = dma.hbm_to_vmem [thread:$0]  %s59_s0, 16, %s10_s7, [#allocation1]  }
   0xc   :  { %40 = dma.done.wait [#allocation1], 16  }
   0xd   :  { %41 = vsyncadd [#allocation1], 4294967280  ;;  %v16_v0 = vld [vmem:[#allocation0] ss:$0 sm:$0xff] }
   0xe   :  { %17 = vst [vmem:[%s60_s1] sm:$0x3] %v16_v0 }
   0xf   :  { %18 = vsyncpa [#allocation1], 1 }

// kernel: fdsm_forward.6
= control target key start
LH: loop header
LB: loop body
LE: loop exit
PB: predicated region body
PF: predicated region fallthrough
CT: control target
= control target key end

     0   :  { %v408_v0 = vmov 1   ;;  %v409_v2 = vmov 3   ;;  %v410_v3 = vmov 2   ;;  %v411_v4 = vmov 4   ;;  %s417_s20 = smov 127   ;;  %s418_s23 = smov 126   ;;  %s565_s1 = inlined_call_operand.vmem [shape: f32[8,9], index: 1, kind: input, shape index: {}]   ;;  %s566_s2 = inlined_call_operand.vmem [shape: f32[8,1], index: 2, kind: input, shape index: {}]   ;;  %s567_s0 = inlined_call_operand.vmem [shape: f32[8,456], index: 0, kind: input, shape index: {}]   ;;  %s568_s3 = inlined_call_operand.vmem [shape: f32[8,384], index: 3, kind: output, shape index: {}]  }
   0x1   :  { %387 = vset.pattern.permute.xlu0 %v408_v0  ;;  %v14_v1 = vld [vmem:[%s565_s1] sm:$0xff]  ;;  %389 = vset.pattern.permute.xlu1 %v409_v2  ;;  %v412_v5 = vmov 5   ;;  %v413_v6 = vmov 6   ;;  %v414_v7 = vmov 7   ;;  %v415_v8 = vmov 0   ;;  %v454_v11 = vld [vmem:[%s567_s0 + $0x10] sm:$0xff] }
   0x2   :  { %34 = vperm.xlu0 %387, %v14_v1   ;;  %94 = vperm.xlu1 %389, %v14_v1   ;;  %v273_v9 = vld [vmem:[%s566_s2] sm:$0xff]  ;;  %v416_v10 = vmov 8   ;;  %v466_v16 = vld [vmem:[%s567_s0 + $0x8] sm:$0xff]  ;;  %v473_v20 = vld [vmem:[%s567_s0 + $0x18] sm:$0xff]  ;;  %s419_s24 = smov 104   ;;  %s421_s25 = smov 102  }
   0x3   :  { %v459_v12 = vld [vmem:[%s567_s0] sm:$0xff]  ;;  %s420_s0 = smov 103   ;;  %s422_s26 = smov 80   ;;  %vm53_vm0 = vcmask 1039360   ;;  %vm83_vm1 = vcmask 1031168   ;;  %vm113_vm2 = vcmask 850944  }
   0x4   :  { %s423_s27 = smov 79   ;;  %s424_s28 = smov 78   ;;  %vm143_vm3 = vcmask 842752   ;;  %vm173_vm4 = vcmask 834560   ;;  %vm203_vm5 = vcmask 654336   ;;  %vm233_vm6 = vcmask 646144  }
   0x5   :  { %vm263_vm7 = vcmask 637952  }
   0x6   :  { %388 = vset.pattern.permute.xlu0 %v410_v3  ;;  %390 = vset.pattern.permute.xlu1 %v411_v4 }
   0x7   :  { %64 = vperm.xlu0 %388, %v14_v1   ;;  %124 = vperm.xlu1 %390, %v14_v1  }
   0xb   :  { %391 = vset.pattern.permute.xlu1 %v412_v5  ;;  %392 = vset.pattern.permute.xlu0 %v413_v6 }
   0xc   :  { %154 = vperm.xlu1 %391, %v14_v1   ;;  %184 = vperm.xlu0 %392, %v14_v1  }
  0x10   :  { %393 = vset.pattern.permute.xlu1 %v414_v7  ;;  %395 = vset.pattern.permute.xlu0 %v415_v8 }
  0x11   :  { %214 = vperm.xlu1 %393, %v14_v1   ;;  %20 = vperm.xlu0 %395, %v14_v1  }
  0x15   :  { %394 = vset.pattern.permute.xlu1 %v416_v10  ;;  %276 = vperm.xlu0 %395, %v273_v9  }
  0x16   :  { %244 = vperm.xlu1 %394, %v14_v1  }
  0x7d   :  { %v35_v13 = vpop.permute.xlu0 %34  ;;  %v95_v23 = vpop.permute.xlu1 %94 }
  0x7e   :  { %v39_v14 = vmul.f32 %v35_v13, %v454_v11  ;;  %v37_v15 = vmul.f32 %v35_v13, %v459_v12  ;;  %v38_v17 = vmul.f32 %v35_v13, %v466_v16  ;;  %v40_v22 = vmul.f32 %v35_v13, %v473_v20 }
  0x7f   :  { %v97_v25 = vmul.f32 %v95_v23, %v459_v12  ;;  %v99_v26 = vmul.f32 %v95_v23, %v454_v11  ;;  %v98_v29 = vmul.f32 %v95_v23, %v466_v16  ;;  %v100_v32 = vmul.f32 %v95_v23, %v473_v20 }
  0x80   :  { %49 = vrot.lane.b32.xlu0 %v39_v14, %s417_s20  ;;  %45 = vrot.lane.b32.xlu1 %v37_v15, %s417_s20 }
  0x82   :  { %v65_v18 = vpop.permute.xlu0 %64  ;;  %v125_v28 = vpop.permute.xlu1 %124 }
  0x83   :  { %v67_v19 = vmul.f32 %v65_v18, %v459_v12  ;;  %v69_v21 = vmul.f32 %v65_v18, %v454_v11  ;;  %v68_v24 = vmul.f32 %v65_v18, %v466_v16  ;;  %v70_v27 = vmul.f32 %v65_v18, %v473_v20 }
  0x84   :  { %47 = vrot.lane.b32.xlu1 %v38_v17, %s417_s20  ;;  %v127_v30 = vmul.f32 %v125_v28, %v459_v12  ;;  %v129_v31 = vmul.f32 %v125_v28, %v454_v11  ;;  %v128_v34 = vmul.f32 %v125_v28, %v466_v16  ;;  %v130_v37 = vmul.f32 %v125_v28, %v473_v20 }
  0x85   :  { %75 = vrot.lane.b32.xlu0 %v67_v19, %s418_s23 }
  0x87   :  { %v155_v33 = vpop.permute.xlu1 %154  ;;  %v185_v38 = vpop.permute.xlu0 %184 }
  0x88   :  { %51 = vrot.lane.b32.xlu1 %v40_v22, %s417_s20  ;;  %v157_v35 = vmul.f32 %v155_v33, %v459_v12  ;;  %v159_v36 = vmul.f32 %v155_v33, %v454_v11  ;;  %v158_v39 = vmul.f32 %v155_v33, %v466_v16  ;;  %v187_v40 = vmul.f32 %v185_v38, %v459_v12 }
  0x89   :  { %79 = vrot.lane.b32.xlu0 %v69_v21, %s418_s23  ;;  %v189_v41 = vmul.f32 %v185_v38, %v454_v11  ;;  %v160_v42 = vmul.f32 %v155_v33, %v473_v20  ;;  %v188_v44 = vmul.f32 %v185_v38, %v466_v16  ;;  %v190_v47 = vmul.f32 %v185_v38, %v473_v20 }
  0x8c   :  { %77 = vrot.lane.b32.xlu1 %v68_v24, %s418_s23  ;;  %v215_v43 = vpop.permute.xlu1 %214  ;;  %v21_v55 = vpop.permute.xlu0 %20 }
  0x8d   :  { %105 = vrot.lane.b32.xlu0 %v97_v25, %s419_s24  ;;  %v217_v45 = vmul.f32 %v215_v43, %v459_v12  ;;  %v219_v46 = vmul.f32 %v215_v43, %v454_v11  ;;  %v218_v49 = vmul.f32 %v215_v43, %v466_v16  ;;  %v220_v52 = vmul.f32 %v215_v43, %v473_v20 }
  0x8e   :  { %v24_v28 = vmul.f32 %v466_v16, %v21_v55 }
  0x90   :  { %81 = vrot.lane.b32.xlu1 %v70_v27, %s418_s23  ;;  %v503_v56 = vpop.permute.xlu0 %276 }
  0x91   :  { %109 = vrot.lane.b32.xlu0 %v99_v26, %s419_s24  ;;  %v245_v48 = vpop.permute.xlu1 %244 }
  0x92   :  { %v248_v50 = vmul.f32 %v245_v48, %v466_v16  ;;  %v250_v51 = vmul.f32 %v245_v48, %v473_v20  ;;  %v247_v53 = vmul.f32 %v245_v48, %v459_v12  ;;  %v249_v54 = vmul.f32 %v245_v48, %v454_v11 }
  0x93   :  { %v23_v20 = vmul.f32 %v459_v12, %v21_v55 }
  0x94   :  { %107 = vrot.lane.b32.xlu1 %v98_v29, %s419_s24  ;;  %v25_v29 = vmul.f32 %v454_v11, %v21_v55 }
  0x95   :  { %135 = vrot.lane.b32.xlu0 %v127_v30, %s420_s0 }
  0x98   :  { %111 = vrot.lane.b32.xlu1 %v100_v32, %s419_s24 }
  0x99   :  { %139 = vrot.lane.b32.xlu0 %v129_v31, %s420_s0 }
  0x9c   :  { %137 = vrot.lane.b32.xlu1 %v128_v34, %s420_s0 }
  0x9d   :  { %165 = vrot.lane.b32.xlu0 %v157_v35, %s421_s25 }
  0xa0   :  { %141 = vrot.lane.b32.xlu1 %v130_v37, %s420_s0 }
  0xa1   :  { %169 = vrot.lane.b32.xlu0 %v159_v36, %s421_s25 }
  0xa4   :  { %167 = vrot.lane.b32.xlu1 %v158_v39, %s421_s25 }
  0xa5   :  { %195 = vrot.lane.b32.xlu0 %v187_v40, %s422_s26 }
  0xa8   :  { %171 = vrot.lane.b32.xlu1 %v160_v42, %s421_s25 }
  0xa9   :  { %199 = vrot.lane.b32.xlu0 %v189_v41, %s422_s26 }
  0xac   :  { %197 = vrot.lane.b32.xlu1 %v188_v44, %s422_s26 }
  0xad   :  { %225 = vrot.lane.b32.xlu0 %v217_v45, %s423_s27 }
  0xb0   :  { %201 = vrot.lane.b32.xlu1 %v190_v47, %s422_s26 }
  0xb1   :  { %229 = vrot.lane.b32.xlu0 %v219_v46, %s423_s27 }
  0xb4   :  { %227 = vrot.lane.b32.xlu1 %v218_v49, %s423_s27 }
  0xb5   :  { %257 = vrot.lane.b32.xlu0 %v248_v50, %s424_s28 }
  0xb8   :  { %231 = vrot.lane.b32.xlu1 %v220_v52, %s423_s27 }
  0xb9   :  { %261 = vrot.lane.b32.xlu0 %v250_v51, %s424_s28 }
  0xbc   :  { %255 = vrot.lane.b32.xlu1 %v247_v53, %s424_s28 }
  0xc0   :  { %259 = vrot.lane.b32.xlu1 %v249_v54, %s424_s28 }
  0xf2   :  { %v46_v57 = vpop.permute.xlu1 %45  ;;  %v50_v58 = vpop.permute.xlu0 %49 }
  0xf6   :  { %v48_v59 = vpop.permute.xlu1 %47 }
  0xf7   :  { %v76_v60 = vpop.permute.xlu0 %75  ;;  %v54_v19 = vsel %vm53_vm0, %v46_v57, %v48_v59  ;;  %v55_v25 = vsel %vm53_vm0, %v48_v59, %v50_v58 }
  0xf8   :  { %v60_v23 = vadd.f32 %v54_v19, %v23_v20  ;;  %v61_v33 = vadd.f32 %v55_v25, %v24_v28 }
  0xfa   :  { %v52_v61 = vpop.permute.xlu1 %51 }
  0xfb   :  { %v80_v62 = vpop.permute.xlu0 %79  ;;  %v56_v26 = vsel %vm53_vm0, %v50_v58, %v52_v61 }
  0xfc   :  { %v62_v34 = vadd.f32 %v56_v26, %v25_v29 }
  0xfe   :  { %v78_v63 = vpop.permute.xlu1 %77 }
  0xff   :  { %v106_v0 = vpop.permute.xlu0 %105  ;;  %v84_v22 = vsel %vm83_vm1, %v76_v60, %v78_v63  ;;  %v85_v31 = vsel %vm83_vm1, %v78_v63, %v80_v62 }
 0x100   :  { %v90_v30 = vadd.f32 %v84_v22, %v60_v23  ;;  %v91_v39 = vadd.f32 %v85_v31, %v61_v33 }
 0x102   :  { %v82_v1 = vpop.permute.xlu1 %81 }
 0x103   :  { %v110_v2 = vpop.permute.xlu0 %109  ;;  %v86_v12 = vsel %vm83_vm1, %v80_v62, %v82_v1 }
 0x104   :  { %v92_v40 = vadd.f32 %v86_v12, %v62_v34 }
 0x106   :  { %v108_v3 = vpop.permute.xlu1 %107 }
 0x107   :  { %v136_v4 = vpop.permute.xlu0 %135  ;;  %v114_v27 = vsel %vm113_vm2, %v106_v0, %v108_v3  ;;  %v115_v38 = vsel %vm113_vm2, %v108_v3, %v110_v2 }
 0x108   :  { %v120_v35 = vadd.f32 %v114_v27, %v90_v30  ;;  %v121_v45 = vadd.f32 %v115_v38, %v91_v39 }
 0x10a   :  { %v112_v5 = vpop.permute.xlu1 %111 }
 0x10b   :  { %v140_v6 = vpop.permute.xlu0 %139  ;;  %v116_v16 = vsel %vm113_vm2, %v110_v2, %v112_v5 }
 0x10c   :  { %v122_v46 = vadd.f32 %v116_v16, %v92_v40 }
 0x10e   :  { %v138_v7 = vpop.permute.xlu1 %137 }
 0x10f   :  { %v166_v8 = vpop.permute.xlu0 %165  ;;  %v144_v32 = vsel %vm143_vm3, %v136_v4, %v138_v7  ;;  %v145_v42 = vsel %vm143_vm3, %v138_v7, %v140_v6 }
 0x110   :  { %v150_v41 = vadd.f32 %v144_v32, %v120_v35  ;;  %v151_v52 = vadd.f32 %v145_v42, %v121_v45 }
 0x112   :  { %v142_v9 = vpop.permute.xlu1 %141 }
 0x113   :  { %v170_v10 = vpop.permute.xlu0 %169  ;;  %v146_v43 = vsel %vm143_vm3, %v140_v6, %v142_v9 }
 0x114   :  { %v152_v53 = vadd.f32 %v146_v43, %v122_v46 }
 0x116   :  { %v168_v13 = vpop.permute.xlu1 %167 }
 0x117   :  { %v196_v14 = vpop.permute.xlu0 %195  ;;  %v174_v11 = vsel %vm173_vm4, %v166_v8, %v168_v13  ;;  %v175_v49 = vsel %vm173_vm4, %v168_v13, %v170_v10 }
 0x118   :  { %v180_v47 = vadd.f32 %v174_v11, %v150_v41  ;;  %v181_v59 = vadd.f32 %v175_v49, %v151_v52 }
 0x11a   :  { %v172_v15 = vpop.permute.xlu1 %171 }
 0x11b   :  { %v200_v17 = vpop.permute.xlu0 %199  ;;  %v176_v50 = vsel %vm173_vm4, %v170_v10, %v172_v15 }
 0x11c   :  { %v182_v60 = vadd.f32 %v176_v50, %v152_v53 }
 0x11e   :  { %v198_v18 = vpop.permute.xlu1 %197 }
 0x11f   :  { %v226_v21 = vpop.permute.xlu0 %225  ;;  %v204_v44 = vsel %vm203_vm5, %v196_v14, %v198_v18  ;;  %v205_v57 = vsel %vm203_vm5, %v198_v18, %v200_v17 }
 0x120   :  { %v210_v54 = vadd.f32 %v204_v44, %v180_v47  ;;  %v211_v2 = vadd.f32 %v205_v57, %v181_v59 }
 0x122   :  { %v202_v24 = vpop.permute.xlu1 %201 }
 0x123   :  { %v230_v36 = vpop.permute.xlu0 %229  ;;  %v206_v58 = vsel %vm203_vm5, %v200_v17, %v202_v24 }
 0x124   :  { %v212_v3 = vadd.f32 %v206_v58, %v182_v60 }
 0x126   :  { %v228_v37 = vpop.permute.xlu1 %227 }
 0x127   :  { %v234_v51 = vsel %vm233_vm6, %v226_v21, %v228_v37  ;;  %v258_v55 = vpop.permute.xlu0 %257  ;;  %v235_v63 = vsel %vm233_vm6, %v228_v37, %v230_v36 }
 0x128   :  { %v240_v61 = vadd.f32 %v234_v51, %v210_v54  ;;  %v241_v5 = vadd.f32 %v235_v63, %v211_v2 }
 0x12a   :  { %v232_v48 = vpop.permute.xlu1 %231 }
 0x12b   :  { %v236_v0 = vsel %vm233_vm6, %v230_v36, %v232_v48  ;;  %v262_v7 = vpop.permute.xlu0 %261 }
 0x12c   :  { %v242_v6 = vadd.f32 %v236_v0, %v212_v3 }
 0x12e   :  { %v256_v62 = vpop.permute.xlu1 %255 }
 0x12f   :  { %v264_v1 = vsel %vm263_vm7, %v256_v62, %v258_v55 }
 0x130   :  { %v270_v4 = vadd.f32 %v264_v1, %v240_v61 }
 0x132   :  { %v528_v8 = vadd.f32 %v503_v56, %v270_v4  ;;  %v260_v9 = vpop.permute.xlu1 %259 }
 0x133   :  { %v265_v10 = vsel %vm263_vm7, %v258_v55, %v260_v9  ;;  %v266_v13 = vsel %vm263_vm7, %v260_v9, %v262_v7 }
 0x134   :  { %v533_v14 = vmul.f32 0.70710677, %v528_v8  ;;  %v271_v15 = vadd.f32 %v265_v10, %v241_v5  ;;  %v272_v17 = vadd.f32 %v266_v13, %v242_v6 }
 0x136   :  { %v288_v18 = vand.u32 2147483647, %v533_v14  ;;  %v537_v19 = vadd.f32 %v503_v56, %v271_v15  ;;  %v540_v20 = vadd.f32 %v503_v56, %v272_v17  ;;  %vm348_vm8 = vcmp.ge.f32.partialorder %v533_v14, 0.0 }
 0x137   :  { %v282_v17 = vmul.f32 0.5, %v528_v8 }
 0x138   :  { %v291_v21 = vmul.f32 0.3275911, %v288_v18  ;;  %v543_v22 = vmul.f32 0.70710677, %v537_v19  ;;  %v546_v23 = vmul.f32 0.70710677, %v540_v20 }
 0x139   :  { %v330_v56 = vsub.f32 0.0, %v288_v18  ;;  %v284_v8 = vmul.f32 0.5, %v540_v20 }
 0x13a   :  { %v294_v24 = vadd.f32 1.0, %v291_v21  ;;  %v289_v25 = vand.u32 2147483647, %v543_v22  ;;  %v290_v26 = vand.u32 2147483647, %v546_v23  ;;  %vm349_vm9 = vcmp.ge.f32.partialorder %v543_v22, 0.0 }
 0x13b   :  { %v333_v31 = vmul.f32 %v330_v56, %v288_v18  ;;  %vm350_vm10 = vcmp.ge.f32.partialorder %v546_v23, 0.0 }
 0x13c   :  { %396 = vrcp.f32 %v294_v24  ;;  %v292_v27 = vmul.f32 0.3275911, %v289_v25  ;;  %v293_v28 = vmul.f32 0.3275911, %v290_v26  ;;  %v331_v12 = vsub.f32 0.0, %v289_v25 }
 0x13d   :  { %v332_v32 = vsub.f32 0.0, %v290_v26  ;;  %v336_v35 = vmul.f32 1.442695, %v333_v31 }
 0x13e   :  { %v295_v29 = vadd.f32 1.0, %v292_v27  ;;  %v296_v30 = vadd.f32 1.0, %v293_v28  ;;  %v334_v36 = vmul.f32 %v331_v12, %v289_v25  ;;  %v283_v28 = vmul.f32 0.5, %v537_v19 }
 0x13f   :  { %v335_v38 = vmul.f32 %v332_v32, %v290_v26 }
 0x140   :  { %398 = vrcp.f32 %v295_v29  ;;  %v338_v41 = vmul.f32 1.442695, %v334_v36 }
 0x141   :  { %400 = vrcp.f32 %v296_v30  ;;  %v340_v44 = vmul.f32 1.442695, %v335_v38 }
 0x142   :  { %402 = vpow2.f32 %v336_v35 }
 0x143   :  { %404 = vpow2.f32 %v338_v41 }
 0x144   :  { %406 = vpow2.f32 %v340_v44 }
 0x149   :  { %v397_v33 = vpop.eup %396 }
 0x14a   :  { %v303_v34 = vmul.f32 1.0614054, %v397_v33 }
 0x14c   :  { %v306_v37 = vadd.f32 -1.4531521, %v303_v34 }
 0x14d   :  { %v399_v16 = vpop.eup %398 }
 0x14e   :  { %v309_v11 = vmul.f32 %v397_v33, %v306_v37  ;;  %v401_v39 = vpop.eup %400  ;;  %v304_v40 = vmul.f32 1.0614054, %v399_v16 }
 0x14f   :  { %v305_v43 = vmul.f32 1.0614054, %v401_v39  ;;  %v403_v61 = vpop.eup %402 }
 0x150   :  { %v312_v42 = vadd.f32 1.4214138, %v309_v11  ;;  %v307_v45 = vadd.f32 -1.4531521, %v304_v40  ;;  %v405_v5 = vpop.eup %404 }
 0x151   :  { %v308_v47 = vadd.f32 -1.4531521, %v305_v43  ;;  %v407_v9 = vpop.eup %406 }
 0x152   :  { %v315_v46 = vmul.f32 %v397_v33, %v312_v42  ;;  %v310_v48 = vmul.f32 %v399_v16, %v307_v45 }
 0x153   :  { %v311_v50 = vmul.f32 %v401_v39, %v308_v47 }
 0x154   :  { %v318_v49 = vadd.f32 -0.28449672, %v315_v46  ;;  %v313_v51 = vadd.f32 1.4214138, %v310_v48 }
 0x155   :  { %v314_v53 = vadd.f32 1.4214138, %v311_v50 }
 0x156   :  { %v321_v52 = vmul.f32 %v397_v33, %v318_v49  ;;  %v316_v54 = vmul.f32 %v399_v16, %v313_v51 }
 0x157   :  { %v317_v57 = vmul.f32 %v401_v39, %v314_v53 }
 0x158   :  { %v324_v55 = vadd.f32 0.2548296, %v321_v52  ;;  %v319_v58 = vadd.f32 -0.28449672, %v316_v54 }
 0x159   :  { %v320_v60 = vadd.f32 -0.28449672, %v317_v57 }
 0x15a   :  { %v327_v59 = vmul.f32 %v397_v33, %v324_v55  ;;  %v322_v62 = vmul.f32 %v399_v16, %v319_v58 }
 0x15b   :  { %v323_v0 = vmul.f32 %v401_v39, %v320_v60 }
 0x15c   :  { %v342_v63 = vmul.f32 %v403_v61, %v327_v59  ;;  %v325_v1 = vadd.f32 0.2548296, %v322_v62 }
 0x15d   :  { %v326_v3 = vadd.f32 0.2548296, %v323_v0 }
 0x15e   :  { %v345_v2 = vsub.f32 1.0, %v342_v63  ;;  %v328_v4 = vmul.f32 %v399_v16, %v325_v1 }
 0x15f   :  { %v329_v7 = vmul.f32 %v401_v39, %v326_v3 }
 0x160   :  { %v351_v6 = vsub.f32 0.0, %v345_v2  ;;  %v343_v10 = vmul.f32 %v405_v5, %v328_v4 }
 0x161   :  { %v344_v15 = vmul.f32 %v407_v9, %v329_v7 }
 0x162   :  { %v354_v13 = vsel %vm348_vm8, %v345_v2, %v351_v6  ;;  %v346_v21 = vsub.f32 1.0, %v343_v10 }
 0x163   :  { %v357_v18 = vadd.f32 1.0, %v354_v13  ;;  %v347_v24 = vsub.f32 1.0, %v344_v15 }
 0x164   :  { %v352_v26 = vsub.f32 0.0, %v346_v21 }
 0x165   :  { %v360_v25 = vmul.f32 %v357_v18, %v282_v17  ;;  %v353_v27 = vsub.f32 0.0, %v347_v24 }
 0x166   :  { %v355_v14 = vsel %vm349_vm9, %v346_v21, %v352_v26 }
 0x167   :  { %363 = vst [vmem:[%s568_s3] sm:$0xff] %v360_v25  ;;  %v356_v29 = vsel %vm350_vm10, %v347_v24, %v353_v27  ;;  %v358_v30 = vadd.f32 1.0, %v355_v14 }
 0x168   :  { %v359_v56 = vadd.f32 1.0, %v356_v29 }
 0x169   :  { %v361_v31 = vmul.f32 %v358_v30, %v283_v28 }
 0x16a   :  { %v362_v12 = vmul.f32 %v359_v56, %v284_v8 }
 0x16b   :  { %364 = vst [vmem:[%s568_s3 + $0x8] sm:$0xff] %v361_v31 }
 0x16c   :  { %365 = vst [vmem:[%s568_s3 + $0x10] sm:$0xff] %v362_v12 }

// kernel: fdsm_forward.7
= control target key start
LH: loop header
LB: loop body
LE: loop exit
PB: predicated region body
PF: predicated region fallthrough
CT: control target
= control target key end

     0   :  { %v938_v0 = vmov 0   ;;  %v939_v2 = vmov 2   ;;  %v940_v3 = vmov 1   ;;  %v941_v4 = vmov 8   ;;  %s963_s17 = smov 127   ;;  %s964_s22 = smov 126   ;;  %s1497_s1 = inlined_call_operand.vmem [shape: f32[8,25], index: 1, kind: input, shape index: {}]   ;;  %s1498_s0 = inlined_call_operand.vmem [shape: f32[8,504], index: 0, kind: input, shape index: {}]   ;;  %s1499_s2 = inlined_call_operand.vmem [shape: f32[8,1], index: 2, kind: input, shape index: {}]   ;;  %s1500_s3 = inlined_call_operand.vmem [shape: f32[8,384], index: 3, kind: output, shape index: {}]  }
   0x1   :  { %899 = vset.pattern.permute.xlu0 %v938_v0  ;;  %v1011_v1 = vld [vmem:[%s1497_s1] sm:$0xff]  ;;  %901 = vset.pattern.permute.xlu1 %v939_v2  ;;  %v942_v5 = vmov 3   ;;  %v943_v6 = vmov 10   ;;  %v944_v7 = vmov 4   ;;  %v945_v8 = vmov 11   ;;  %v1045_v27 = vld [vmem:[%s1498_s0 + $0x18] sm:$0xff] }
   0x2   :  { %20 = vperm.xlu0 %899, %v1011_v1   ;;  %64 = vperm.xlu1 %901, %v1011_v1   ;;  %v946_v9 = vmov 5   ;;  %v947_v10 = vmov 13   ;;  %v948_v11 = vmov 6   ;;  %v949_v12 = vmov 14   ;;  %v1050_v28 = vld [vmem:[%s1498_s0] sm:$0xff]  ;;  %v1058_v34 = vld [vmem:[%s1498_s0 + $0x8] sm:$0xff] }
   0x3   :  { %v950_v13 = vmov 7   ;;  %v951_v14 = vmov 16   ;;  %v952_v15 = vmov 9   ;;  %v953_v16 = vmov 17   ;;  %v1064_v37 = vld [vmem:[%s1498_s0 + $0x10] sm:$0xff]  ;;  %s965_s23 = smov 125  }
   0x4   :  { %v954_v17 = vmov 12   ;;  %v955_v18 = vmov 19   ;;  %v956_v19 = vmov 15   ;;  %v957_v20 = vmov 20   ;;  %s966_s0 = smov 124   ;;  %s967_s24 = smov 104  }
   0x5   :  { %v958_v21 = vmov 18   ;;  %v959_v22 = vmov 22   ;;  %v960_v23 = vmov 21   ;;  %v961_v24 = vmov 23   ;;  %s968_s25 = smov 103   ;;  %s969_s26 = smov 102  }
   0x6   :  { %900 = vset.pattern.permute.xlu0 %v940_v3  ;;  %907 = vset.pattern.permute.xlu1 %v941_v4  ;;  %v962_v25 = vmov 24   ;;  %s970_s27 = smov 101   ;;  %s971_s28 = smov 100   ;;  %vm53_vm0 = vcmask 1039360   ;;  %vm83_vm1 = vcmask 1031168   ;;  %vm113_vm2 = vcmask 1022976  }
   0x7   :  { %34 = vperm.xlu0 %900, %v1011_v1   ;;  %244 = vperm.xlu1 %907, %v1011_v1   ;;  %s972_s29 = smov 80   ;;  %s973_s30 = smov 79   ;;  %vm143_vm3 = vcmask 1014784   ;;  %vm173_vm4 = vcmask 850944   ;;  %vm203_vm5 = vcmask 842752   ;;  %vm233_vm6 = vcmask 834560  }
   0x8   :  { %s974_s4 = smov 78   ;;  %s975_s5 = smov 77   ;;  %vm263_vm7 = vcmask 826368   ;;  %vm293_vm8 = vcmask 818176   ;;  %vm323_vm9 = vcmask 654336   ;;  %vm353_vm10 = vcmask 646144  }
   0x9   :  { %s976_s6 = smov 76   ;;  %s977_s7 = smov 56   ;;  %vm383_vm11 = vcmask 637952   ;;  %vm413_vm12 = vcmask 629760   ;;  %vm443_vm13 = vcmask 621568   ;;  %vm473_vm14 = vcmask 457728  }
   0xa   :  { %s978_s8 = smov 55   ;;  %s979_s9 = smov 54   ;;  %vm503_vm15 = vcmask 449536  }
   0xb   :  { %902 = vset.pattern.permute.xlu0 %v942_v5  ;;  %909 = vset.pattern.permute.xlu1 %v943_v6  ;;  %s980_s10 = smov 53   ;;  %s981_s11 = smov 52  }
   0xc   :  { %94 = vperm.xlu0 %902, %v1011_v1   ;;  %304 = vperm.xlu1 %909, %v1011_v1   ;;  %s982_s12 = smov 32   ;;  %s983_s13 = smov 31  }
   0xd   :  { %s984_s1 = smov 30   ;;  %s985_s14 = smov 29  }
   0xe   :  { %s986_s15 = smov 28  }
  0x10   :  { %903 = vset.pattern.permute.xlu0 %v944_v7  ;;  %910 = vset.pattern.permute.xlu1 %v945_v8 }
  0x11   :  { %124 = vperm.xlu0 %903, %v1011_v1   ;;  %334 = vperm.xlu1 %910, %v1011_v1  }
  0x15   :  { %904 = vset.pattern.permute.xlu0 %v946_v9  ;;  %912 = vset.pattern.permute.xlu1 %v947_v10 }
  0x16   :  { %154 = vperm.xlu0 %904, %v1011_v1   ;;  %394 = vperm.xlu1 %912, %v1011_v1  }
  0x1a   :  { %905 = vset.pattern.permute.xlu0 %v948_v11  ;;  %913 = vset.pattern.permute.xlu1 %v949_v12 }
  0x1b   :  { %184 = vperm.xlu0 %905, %v1011_v1   ;;  %424 = vperm.xlu1 %913, %v1011_v1  }
  0x1f   :  { %906 = vset.pattern.permute.xlu0 %v950_v13  ;;  %915 = vset.pattern.permute.xlu1 %v951_v14 }
  0x20   :  { %214 = vperm.xlu0 %906, %v1011_v1   ;;  %484 = vperm.xlu1 %915, %v1011_v1  }
  0x24   :  { %908 = vset.pattern.permute.xlu0 %v952_v15  ;;  %916 = vset.pattern.permute.xlu1 %v953_v16 }
  0x25   :  { %274 = vperm.xlu0 %908, %v1011_v1   ;;  %514 = vperm.xlu1 %916, %v1011_v1  }
  0x29   :  { %911 = vset.pattern.permute.xlu0 %v954_v17  ;;  %918 = vset.pattern.permute.xlu1 %v955_v18 }
  0x2a   :  { %364 = vperm.xlu0 %911, %v1011_v1   ;;  %574 = vperm.xlu1 %918, %v1011_v1  }
  0x2e   :  { %914 = vset.pattern.permute.xlu0 %v956_v19  ;;  %919 = vset.pattern.permute.xlu1 %v957_v20 }
  0x2f   :  { %454 = vperm.xlu0 %914, %v1011_v1   ;;  %604 = vperm.xlu1 %919, %v1011_v1  }
  0x33   :  { %917 = vset.pattern.permute.xlu0 %v958_v21  ;;  %921 = vset.pattern.permute.xlu1 %v959_v22 }
  0x34   :  { %544 = vperm.xlu0 %917, %v1011_v1   ;;  %664 = vperm.xlu1 %921, %v1011_v1  }
  0x38   :  { %920 = vset.pattern.permute.xlu0 %v960_v23  ;;  %922 = vset.pattern.permute.xlu1 %v961_v24 }
  0x39   :  { %634 = vperm.xlu0 %920, %v1011_v1   ;;  %694 = vperm.xlu1 %922, %v1011_v1  }
  0x3d   :  { %923 = vset.pattern.permute.xlu0 %v962_v25  ;;  %924 = vset.pattern.permute.xlu1 %v938_v0 }
  0x3e   :  { %724 = vperm.xlu0 %923, %v1011_v1  }
  0x42   :  { %925 = vset.pattern.permute.xlu0 %v938_v0 }
  0x7d   :  { %v1040_v26 = vpop.permute.xlu0 %20  ;;  %v65_v30 = vpop.permute.xlu1 %64 }
  0x7e   :  { %v67_v33 = vmul.f32 %v65_v30, %v1050_v28  ;;  %v69_v38 = vmul.f32 %v65_v30, %v1064_v37  ;;  %v68_v42 = vmul.f32 %v65_v30, %v1058_v34  ;;  %v70_v45 = vmul.f32 %v65_v30, %v1045_v27 }
  0x82   :  { %v35_v29 = vpop.permute.xlu0 %34  ;;  %v1083_v53 = vpop.permute.xlu1 %244 }
  0x83   :  { %v40_v31 = vmul.f32 %v35_v29, %v1045_v27  ;;  %v37_v32 = vmul.f32 %v35_v29, %v1050_v28  ;;  %v38_v35 = vmul.f32 %v35_v29, %v1058_v34  ;;  %v39_v39 = vmul.f32 %v35_v29, %v1064_v37 }
  0x84   :  { %v248_v55 = vmul.f32 %v1083_v53, %v1058_v34  ;;  %v250_v57 = vmul.f32 %v1083_v53, %v1045_v27  ;;  %v247_v22 = vmul.f32 %v1083_v53, %v1050_v28  ;;  %v249_v29 = vmul.f32 %v1083_v53, %v1064_v37 }
  0x85   :  { %51 = vrot.lane.b32.xlu0 %v40_v31, %s963_s17  ;;  %45 = vrot.lane.b32.xlu1 %v37_v32, %s963_s17 }
  0x87   :  { %v95_v36 = vpop.permute.xlu0 %94  ;;  %v1107_v0 = vpop.permute.xlu1 %304 }
  0x88   :  { %v99_v41 = vmul.f32 %v95_v36, %v1064_v37  ;;  %v97_v47 = vmul.f32 %v95_v36, %v1050_v28  ;;  %v98_v50 = vmul.f32 %v95_v36, %v1058_v34  ;;  %v100_v54 = vmul.f32 %v95_v36, %v1045_v27 }
  0x89   :  { %75 = vrot.lane.b32.xlu0 %v67_v33, %s964_s22  ;;  %47 = vrot.lane.b32.xlu1 %v38_v35, %s963_s17  ;;  %v308_v1 = vmul.f32 %v1107_v0, %v1058_v34  ;;  %v310_v3 = vmul.f32 %v1107_v0, %v1045_v27 }
  0x8c   :  { %v125_v40 = vpop.permute.xlu0 %124  ;;  %v1118_v4 = vpop.permute.xlu1 %334 }
  0x8d   :  { %79 = vrot.lane.b32.xlu0 %v69_v38, %s964_s22  ;;  %49 = vrot.lane.b32.xlu1 %v39_v39, %s963_s17  ;;  %v129_v43 = vmul.f32 %v125_v40, %v1064_v37  ;;  %v127_v56 = vmul.f32 %v125_v40, %v1050_v28  ;;  %v128_v59 = vmul.f32 %v125_v40, %v1058_v34 }
  0x8e   :  { %v130_v61 = vmul.f32 %v125_v40, %v1045_v27  ;;  %v338_v6 = vmul.f32 %v1118_v4, %v1058_v34  ;;  %v340_v8 = vmul.f32 %v1118_v4, %v1045_v27  ;;  %v307_v39 = vmul.f32 %v1107_v0, %v1050_v28 }
  0x91   :  { %109 = vrot.lane.b32.xlu0 %v99_v41, %s965_s23  ;;  %77 = vrot.lane.b32.xlu1 %v68_v42, %s964_s22  ;;  %v155_v44 = vpop.permute.xlu0 %154  ;;  %v1144_v15 = vpop.permute.xlu1 %394 }
  0x92   :  { %v159_v46 = vmul.f32 %v155_v44, %v1064_v37  ;;  %v157_v63 = vmul.f32 %v155_v44, %v1050_v28  ;;  %v158_v2 = vmul.f32 %v155_v44, %v1058_v34  ;;  %v160_v5 = vmul.f32 %v155_v44, %v1045_v27 }
  0x93   :  { %v398_v16 = vmul.f32 %v1144_v15, %v1058_v34  ;;  %v400_v18 = vmul.f32 %v1144_v15, %v1045_v27 }
  0x95   :  { %139 = vrot.lane.b32.xlu0 %v129_v43, %s966_s0  ;;  %81 = vrot.lane.b32.xlu1 %v70_v45, %s964_s22  ;;  %v309_v43 = vmul.f32 %v1107_v0, %v1064_v37  ;;  %v337_v45 = vmul.f32 %v1118_v4, %v1050_v28 }
  0x96   :  { %v185_v48 = vpop.permute.xlu0 %184  ;;  %v1156_v19 = vpop.permute.xlu1 %424 }
  0x97   :  { %v189_v49 = vmul.f32 %v185_v48, %v1064_v37  ;;  %v187_v7 = vmul.f32 %v185_v48, %v1050_v28  ;;  %v188_v10 = vmul.f32 %v185_v48, %v1058_v34  ;;  %v190_v12 = vmul.f32 %v185_v48, %v1045_v27 }
  0x98   :  { %v428_v21 = vmul.f32 %v1156_v19, %v1058_v34  ;;  %v430_v24 = vmul.f32 %v1156_v19, %v1045_v27 }
  0x99   :  { %169 = vrot.lane.b32.xlu0 %v159_v46, %s967_s24  ;;  %105 = vrot.lane.b32.xlu1 %v97_v47, %s965_s23 }
  0x9b   :  { %v1078_v51 = vpop.permute.xlu0 %214  ;;  %v1166_v23 = vpop.permute.xlu1 %484 }
  0x9c   :  { %v219_v52 = vmul.f32 %v1078_v51, %v1064_v37  ;;  %v217_v14 = vmul.f32 %v1078_v51, %v1050_v28  ;;  %v218_v17 = vmul.f32 %v1078_v51, %v1058_v34  ;;  %v220_v20 = vmul.f32 %v1078_v51, %v1045_v27 }
  0x9d   :  { %199 = vrot.lane.b32.xlu0 %v189_v49, %s968_s25  ;;  %107 = vrot.lane.b32.xlu1 %v98_v50, %s965_s23  ;;  %v488_v38 = vmul.f32 %v1166_v23, %v1058_v34  ;;  %v490_v42 = vmul.f32 %v1166_v23, %v1045_v27  ;;  %v339_v49 = vmul.f32 %v1118_v4, %v1064_v37 }
  0xa0   :  { %v1094_v58 = vpop.permute.xlu0 %274  ;;  %v1182_v32 = vpop.permute.xlu1 %514 }
  0xa1   :  { %229 = vrot.lane.b32.xlu0 %v219_v52, %s969_s26  ;;  %111 = vrot.lane.b32.xlu1 %v100_v54, %s965_s23  ;;  %v278_v60 = vmul.f32 %v1094_v58, %v1058_v34  ;;  %v280_v62 = vmul.f32 %v1094_v58, %v1045_v27  ;;  %v277_v31 = vmul.f32 %v1094_v58, %v1050_v28 }
  0xa2   :  { %v279_v35 = vmul.f32 %v1094_v58, %v1064_v37  ;;  %v518_v44 = vmul.f32 %v1182_v32, %v1058_v34  ;;  %v520_v48 = vmul.f32 %v1182_v32, %v1045_v27 }
  0xa5   :  { %257 = vrot.lane.b32.xlu0 %v248_v55, %s970_s27  ;;  %135 = vrot.lane.b32.xlu1 %v127_v56, %s966_s0  ;;  %v1130_v9 = vpop.permute.xlu0 %364  ;;  %v1190_v36 = vpop.permute.xlu1 %574 }
  0xa6   :  { %v368_v11 = vmul.f32 %v1130_v9, %v1058_v34  ;;  %v370_v13 = vmul.f32 %v1130_v9, %v1045_v27  ;;  %v367_v53 = vmul.f32 %v1130_v9, %v1050_v28 }
  0xa9   :  { %261 = vrot.lane.b32.xlu0 %v250_v57, %s970_s27  ;;  %137 = vrot.lane.b32.xlu1 %v128_v59, %s966_s0  ;;  %v369_v57 = vmul.f32 %v1130_v9, %v1064_v37 }
  0xaa   :  { %v1172_v25 = vpop.permute.xlu0 %454  ;;  %v1200_v40 = vpop.permute.xlu1 %604 }
  0xab   :  { %v458_v30 = vmul.f32 %v1172_v25, %v1058_v34  ;;  %v460_v33 = vmul.f32 %v1172_v25, %v1045_v27 }
  0xad   :  { %287 = vrot.lane.b32.xlu0 %v278_v60, %s971_s28  ;;  %141 = vrot.lane.b32.xlu1 %v130_v61, %s966_s0  ;;  %v578_v60 = vmul.f32 %v1190_v36, %v1058_v34  ;;  %v397_v61 = vmul.f32 %v1144_v15, %v1050_v28 }
  0xaf   :  { %v1202_v41 = vpop.permute.xlu0 %544  ;;  %v1214_v46 = vpop.permute.xlu1 %664 }
  0xb0   :  { %v548_v52 = vmul.f32 %v1202_v41, %v1058_v34  ;;  %v550_v54 = vmul.f32 %v1202_v41, %v1045_v27 }
  0xb1   :  { %291 = vrot.lane.b32.xlu0 %v280_v62, %s971_s28  ;;  %165 = vrot.lane.b32.xlu1 %v157_v63, %s967_s24  ;;  %v25_v62 = vmul.f32 %v1040_v26, %v1064_v37 }
  0xb4   :  { %v1216_v47 = vpop.permute.xlu0 %634  ;;  %v1226_v50 = vpop.permute.xlu1 %694 }
  0xb5   :  { %317 = vrot.lane.b32.xlu0 %v308_v1, %s972_s29  ;;  %167 = vrot.lane.b32.xlu1 %v158_v2, %s967_s24  ;;  %v580_v1 = vmul.f32 %v1190_v36, %v1045_v27  ;;  %v399_v2 = vmul.f32 %v1144_v15, %v1064_v37 }
  0xb9   :  { %321 = vrot.lane.b32.xlu0 %v310_v3, %s972_s29  ;;  %171 = vrot.lane.b32.xlu1 %v160_v5, %s967_s24  ;;  %v1228_v51 = vpop.permute.xlu0 %724 }
  0xbd   :  { %347 = vrot.lane.b32.xlu0 %v338_v6, %s973_s30  ;;  %195 = vrot.lane.b32.xlu1 %v187_v7, %s968_s25  ;;  %v23_v6 = vmul.f32 %v1040_v26, %v1050_v28  ;;  %v24_v7 = vmul.f32 %v1040_v26, %v1058_v34 }
  0xc1   :  { %351 = vrot.lane.b32.xlu0 %v340_v8, %s973_s30  ;;  %197 = vrot.lane.b32.xlu1 %v188_v10, %s968_s25 }
  0xc5   :  { %377 = vrot.lane.b32.xlu0 %v368_v11, %s974_s4  ;;  %201 = vrot.lane.b32.xlu1 %v190_v12, %s968_s25 }
  0xc9   :  { %381 = vrot.lane.b32.xlu0 %v370_v13, %s974_s4  ;;  %225 = vrot.lane.b32.xlu1 %v217_v14, %s969_s26  ;;  %v608_v13 = vmul.f32 %v1200_v40, %v1058_v34  ;;  %v427_v14 = vmul.f32 %v1156_v19, %v1050_v28 }
  0xcd   :  { %407 = vrot.lane.b32.xlu0 %v398_v16, %s975_s5  ;;  %227 = vrot.lane.b32.xlu1 %v218_v17, %s969_s26 }
  0xd1   :  { %411 = vrot.lane.b32.xlu0 %v400_v18, %s975_s5  ;;  %231 = vrot.lane.b32.xlu1 %v220_v20, %s969_s26 }
  0xd5   :  { %437 = vrot.lane.b32.xlu0 %v428_v21, %s976_s6  ;;  %255 = vrot.lane.b32.xlu1 %v247_v22, %s970_s27  ;;  %v610_v21 = vmul.f32 %v1200_v40, %v1045_v27  ;;  %v429_v22 = vmul.f32 %v1156_v19, %v1064_v37  ;;  %v640_v19 = vmul.f32 %v1216_v47, %v1045_v27 }
  0xd9   :  { %441 = vrot.lane.b32.xlu0 %v430_v24, %s976_s6  ;;  %259 = vrot.lane.b32.xlu1 %v249_v29, %s970_s27 }
  0xdd   :  { %467 = vrot.lane.b32.xlu0 %v458_v30, %s977_s7  ;;  %285 = vrot.lane.b32.xlu1 %v277_v31, %s971_s28  ;;  %v638_v30 = vmul.f32 %v1216_v47, %v1058_v34  ;;  %v457_v31 = vmul.f32 %v1172_v25, %v1050_v28 }
  0xe1   :  { %471 = vrot.lane.b32.xlu0 %v460_v33, %s977_s7  ;;  %289 = vrot.lane.b32.xlu1 %v279_v35, %s971_s28 }
  0xe5   :  { %497 = vrot.lane.b32.xlu0 %v488_v38, %s978_s8  ;;  %315 = vrot.lane.b32.xlu1 %v307_v39, %s972_s29 }
  0xe9   :  { %501 = vrot.lane.b32.xlu0 %v490_v42, %s978_s8  ;;  %319 = vrot.lane.b32.xlu1 %v309_v43, %s972_s29  ;;  %v459_v42 = vmul.f32 %v1172_v25, %v1064_v37 }
  0xed   :  { %527 = vrot.lane.b32.xlu0 %v518_v44, %s979_s9  ;;  %345 = vrot.lane.b32.xlu1 %v337_v45, %s973_s30 }
  0xf1   :  { %531 = vrot.lane.b32.xlu0 %v520_v48, %s979_s9  ;;  %349 = vrot.lane.b32.xlu1 %v339_v49, %s973_s30 }
  0xf5   :  { %557 = vrot.lane.b32.xlu0 %v548_v52, %s980_s10  ;;  %375 = vrot.lane.b32.xlu1 %v367_v53, %s974_s4  ;;  %v668_v53 = vmul.f32 %v1214_v46, %v1058_v34 }
  0xf7   :  { %v52_v55 = vpop.permute.xlu0 %51  ;;  %v46_v56 = vpop.permute.xlu1 %45 }
  0xf9   :  { %561 = vrot.lane.b32.xlu0 %v550_v54, %s980_s10  ;;  %379 = vrot.lane.b32.xlu1 %v369_v57, %s974_s4  ;;  %v487_v54 = vmul.f32 %v1166_v23, %v1050_v28 }
  0xfb   :  { %v76_v58 = vpop.permute.xlu0 %75  ;;  %v48_v59 = vpop.permute.xlu1 %47 }
  0xfc   :  { %v54_v3 = vsel %vm53_vm0, %v46_v56, %v48_v59 }
  0xfd   :  { %587 = vrot.lane.b32.xlu0 %v578_v60, %s981_s11  ;;  %405 = vrot.lane.b32.xlu1 %v397_v61, %s975_s5  ;;  %v60_v9 = vadd.f32 %v54_v3, %v23_v6  ;;  %v519_v6 = vmul.f32 %v1182_v32, %v1064_v37 }
  0xff   :  { %v80_v63 = vpop.permute.xlu0 %79  ;;  %v50_v0 = vpop.permute.xlu1 %49 }
 0x100   :  { %v55_v4 = vsel %vm53_vm0, %v48_v59, %v50_v0  ;;  %v56_v5 = vsel %vm53_vm0, %v50_v0, %v52_v55  ;;  %v489_v59 = vmul.f32 %v1166_v23, %v1064_v37  ;;  %vm533_vm0 = vcmask 441344  }
 0x101   :  { %v62_v8 = vadd.f32 %v56_v5, %v25_v62  ;;  %591 = vrot.lane.b32.xlu0 %v580_v1, %s981_s11  ;;  %409 = vrot.lane.b32.xlu1 %v399_v2, %s975_s5  ;;  %v61_v10 = vadd.f32 %v55_v4, %v24_v7  ;;  %v698_v62 = vmul.f32 %v1226_v50, %v1058_v34 }
 0x102   :  { %v700_v5 = vmul.f32 %v1226_v50, %v1045_v27 }
 0x103   :  { %v110_v11 = vpop.permute.xlu0 %109  ;;  %v78_v12 = vpop.permute.xlu1 %77 }
 0x104   :  { %v84_v15 = vsel %vm83_vm1, %v76_v58, %v78_v12  ;;  %v85_v26 = vsel %vm83_vm1, %v78_v12, %v80_v63  ;;  %v670_v58 = vmul.f32 %v1214_v46, %v1045_v27 }
 0x105   :  { %v90_v16 = vadd.f32 %v84_v15, %v60_v9  ;;  %v91_v17 = vadd.f32 %v85_v26, %v61_v10  ;;  %617 = vrot.lane.b32.xlu0 %v608_v13, %s982_s12  ;;  %435 = vrot.lane.b32.xlu1 %v427_v14, %s976_s6  ;;  %v727_v9 = vmul.f32 %v1228_v51, %v1050_v28 }
 0x106   :  { %v729_v13 = vmul.f32 %v1228_v51, %v1064_v37 }
 0x107   :  { %v140_v18 = vpop.permute.xlu0 %139  ;;  %v82_v20 = vpop.permute.xlu1 %81 }
 0x108   :  { %v86_v24 = vsel %vm83_vm1, %v80_v63, %v82_v20  ;;  %v517_v63 = vmul.f32 %v1182_v32, %v1050_v28  ;;  %v549_v32 = vmul.f32 %v1202_v41, %v1064_v37  ;;  %vm563_vm1 = vcmask 433152  }
 0x109   :  { %v92_v29 = vadd.f32 %v86_v24, %v62_v8  ;;  %621 = vrot.lane.b32.xlu0 %v610_v21, %s982_s12  ;;  %439 = vrot.lane.b32.xlu1 %v429_v22, %s976_s6  ;;  %v547_v8 = vmul.f32 %v1202_v41, %v1050_v28  ;;  %v577_v21 = vmul.f32 %v1190_v36, %v1050_v28 }
 0x10b   :  { %v1279_v33 = vpop.permute.xlu0 %169  ;;  %v106_v35 = vpop.permute.xlu1 %105 }
 0x10d   :  { %647 = vrot.lane.b32.xlu0 %v638_v30, %s983_s13  ;;  %465 = vrot.lane.b32.xlu1 %v457_v31, %s977_s7  ;;  %v579_v30 = vmul.f32 %v1190_v36, %v1064_v37  ;;  %v609_v36 = vmul.f32 %v1200_v40, %v1064_v37 }
 0x10f   :  { %v1285_v38 = vpop.permute.xlu0 %199  ;;  %v108_v39 = vpop.permute.xlu1 %107 }
 0x110   :  { %v114_v43 = vsel %vm113_vm2, %v106_v35, %v108_v39  ;;  %v115_v44 = vsel %vm113_vm2, %v108_v39, %v110_v11  ;;  %v607_v35 = vmul.f32 %v1200_v40, %v1050_v28 }
 0x111   :  { %v120_v45 = vadd.f32 %v114_v43, %v90_v16  ;;  %v121_v48 = vadd.f32 %v115_v44, %v91_v17  ;;  %651 = vrot.lane.b32.xlu0 %v640_v19, %s983_s13  ;;  %469 = vrot.lane.b32.xlu1 %v459_v42, %s977_s7 }
 0x113   :  { %v1291_v49 = vpop.permute.xlu0 %229  ;;  %v112_v52 = vpop.permute.xlu1 %111 }
 0x114   :  { %v116_v55 = vsel %vm113_vm2, %v110_v11, %v112_v52  ;;  %vm593_vm2 = vcmask 424960  }
 0x115   :  { %v122_v56 = vadd.f32 %v116_v55, %v92_v29  ;;  %677 = vrot.lane.b32.xlu0 %v668_v53, %s984_s1  ;;  %495 = vrot.lane.b32.xlu1 %v487_v54, %s978_s8  ;;  %v637_v53 = vmul.f32 %v1216_v47, %v1050_v28  ;;  %v639_v55 = vmul.f32 %v1216_v47, %v1064_v37 }
 0x117   :  { %v1299_v25 = vpop.permute.xlu0 %257  ;;  %v136_v57 = vpop.permute.xlu1 %135 }
 0x119   :  { %681 = vrot.lane.b32.xlu0 %v670_v58, %s984_s1  ;;  %499 = vrot.lane.b32.xlu1 %v489_v59, %s978_s8 }
 0x11b   :  { %v1307_v60 = vpop.permute.xlu0 %261  ;;  %v138_v61 = vpop.permute.xlu1 %137 }
 0x11c   :  { %v144_v0 = vsel %vm143_vm3, %v136_v57, %v138_v61  ;;  %v145_v1 = vsel %vm143_vm3, %v138_v61, %v140_v18 }
 0x11d   :  { %v150_v2 = vadd.f32 %v144_v0, %v120_v45  ;;  %v151_v23 = vadd.f32 %v145_v1, %v121_v48  ;;  %707 = vrot.lane.b32.xlu0 %v698_v62, %s985_s14  ;;  %525 = vrot.lane.b32.xlu1 %v517_v63, %s979_s9  ;;  %v667_v62 = vmul.f32 %v1214_v46, %v1050_v28 }
 0x11f   :  { %v1317_v3 = vpop.permute.xlu0 %287  ;;  %v142_v4 = vpop.permute.xlu1 %141 }
 0x120   :  { %v146_v7 = vsel %vm143_vm3, %v140_v18, %v142_v4  ;;  %vm623_vm3 = vcmask 261120  }
 0x121   :  { %v152_v10 = vadd.f32 %v146_v7, %v122_v56  ;;  %711 = vrot.lane.b32.xlu0 %v700_v5, %s985_s14  ;;  %529 = vrot.lane.b32.xlu1 %v519_v6, %s979_s9  ;;  %v697_v6 = vmul.f32 %v1226_v50, %v1050_v28 }
 0x123   :  { %v1330_v11 = vpop.permute.xlu0 %291  ;;  %v166_v12 = vpop.permute.xlu1 %165 }
 0x125   :  { %555 = vrot.lane.b32.xlu1 %v547_v8, %s980_s10  ;;  %735 = vrot.lane.b32.xlu0 %v727_v9, %s986_s15 }
 0x127   :  { %v168_v14 = vpop.permute.xlu1 %167  ;;  %v1338_v15 = vpop.permute.xlu0 %317 }
 0x128   :  { %v174_v26 = vsel %vm173_vm4, %v166_v12, %v168_v14  ;;  %v175_v16 = vsel %vm173_vm4, %v168_v14, %v1279_v33  ;;  %v699_v12 = vmul.f32 %v1226_v50, %v1064_v37 }
 0x129   :  { %v180_v17 = vadd.f32 %v174_v26, %v150_v2  ;;  %v181_v18 = vadd.f32 %v175_v16, %v151_v23  ;;  %559 = vrot.lane.b32.xlu1 %v549_v32, %s980_s10  ;;  %739 = vrot.lane.b32.xlu0 %v729_v13, %s986_s15  ;;  %v669_v2 = vmul.f32 %v1214_v46, %v1064_v37 }
 0x12a   :  { %v728_v37 = vmul.f32 %v1228_v51, %v1058_v34 }
 0x12b   :  { %v172_v20 = vpop.permute.xlu1 %171  ;;  %v1347_v41 = vpop.permute.xlu0 %321 }
 0x12c   :  { %v176_v22 = vsel %vm173_vm4, %v1279_v33, %v172_v20  ;;  %vm653_vm4 = vcmask 252928  }
 0x12d   :  { %v182_v24 = vadd.f32 %v176_v22, %v152_v10  ;;  %585 = vrot.lane.b32.xlu1 %v577_v21, %s981_s11  ;;  %v730_v22 = vmul.f32 %v1228_v51, %v1045_v27 }
 0x12f   :  { %v196_v29 = vpop.permute.xlu1 %195  ;;  %v1354_v19 = vpop.permute.xlu0 %347 }
 0x131   :  { %589 = vrot.lane.b32.xlu1 %v579_v30, %s981_s11 }
 0x133   :  { %v198_v31 = vpop.permute.xlu1 %197  ;;  %v1362_v52 = vpop.permute.xlu0 %351 }
 0x134   :  { %v204_v39 = vsel %vm203_vm5, %v196_v29, %v198_v31  ;;  %v205_v33 = vsel %vm203_vm5, %v198_v31, %v1285_v38 }
 0x135   :  { %v210_v42 = vadd.f32 %v204_v39, %v180_v17  ;;  %v211_v43 = vadd.f32 %v205_v33, %v181_v18  ;;  %615 = vrot.lane.b32.xlu1 %v607_v35, %s982_s12 }
 0x137   :  { %v202_v44 = vpop.permute.xlu1 %201  ;;  %v1369_v57 = vpop.permute.xlu0 %377 }
 0x138   :  { %v206_v45 = vsel %vm203_vm5, %v1285_v38, %v202_v44  ;;  %vm683_vm5 = vcmask 244736  }
 0x139   :  { %v212_v48 = vadd.f32 %v206_v45, %v182_v24  ;;  %619 = vrot.lane.b32.xlu1 %v609_v36, %s982_s12 }
 0x13b   :  { %v226_v54 = vpop.permute.xlu1 %225  ;;  %v382_v47 = vpop.permute.xlu0 %381 }
 0x13d   :  { %645 = vrot.lane.b32.xlu1 %v637_v53, %s983_s13 }
 0x13f   :  { %v228_v56 = vpop.permute.xlu1 %227  ;;  %v1383_v7 = vpop.permute.xlu0 %407 }
 0x140   :  { %v234_v40 = vsel %vm233_vm6, %v226_v54, %v228_v56  ;;  %v235_v38 = vsel %vm233_vm6, %v228_v56, %v1291_v49 }
 0x141   :  { %v240_v58 = vadd.f32 %v234_v40, %v210_v42  ;;  %v241_v59 = vadd.f32 %v235_v38, %v211_v43  ;;  %649 = vrot.lane.b32.xlu1 %v639_v55, %s983_s13 }
 0x143   :  { %v232_v61 = vpop.permute.xlu1 %231  ;;  %v412_v28 = vpop.permute.xlu0 %411 }
 0x144   :  { %v236_v63 = vsel %vm233_vm6, %v1291_v49, %v232_v61  ;;  %vm713_vm6 = vcmask 236544  }
 0x145   :  { %v242_v0 = vadd.f32 %v236_v63, %v212_v48  ;;  %675 = vrot.lane.b32.xlu1 %v667_v62, %s984_s1 }
 0x147   :  { %v256_v1 = vpop.permute.xlu1 %255  ;;  %v438_v18 = vpop.permute.xlu0 %437 }
 0x148   :  { %v264_v23 = vsel %vm263_vm7, %v256_v1, %v1299_v25 }
 0x149   :  { %v270_v4 = vadd.f32 %v264_v23, %v240_v58  ;;  %679 = vrot.lane.b32.xlu1 %v669_v2, %s984_s1 }
 0x14b   :  { %v260_v5 = vpop.permute.xlu1 %259  ;;  %v442_v34 = vpop.permute.xlu0 %441 }
 0x14c   :  { %v265_v49 = vsel %vm263_vm7, %v1299_v25, %v260_v5  ;;  %v266_v8 = vsel %vm263_vm7, %v260_v5, %v1307_v60  ;;  %v753_v25 = vld [vmem:[%s1499_s2] sm:$0xff]  ;;  %vm743_vm7 = vcmask 228352  }
 0x14d   :  { %v271_v9 = vadd.f32 %v265_v49, %v241_v59  ;;  %v272_v10 = vadd.f32 %v266_v8, %v242_v0  ;;  %705 = vrot.lane.b32.xlu1 %v697_v6, %s985_s14 }
 0x14f   :  { %v286_v46 = vpop.permute.xlu1 %285  ;;  %v1407_v42 = vpop.permute.xlu0 %467 }
 0x150   :  { %v294_v13 = vsel %vm293_vm8, %v286_v46, %v1317_v3 }
 0x151   :  { %v300_v32 = vadd.f32 %v294_v13, %v270_v4  ;;  %709 = vrot.lane.b32.xlu1 %v699_v12, %s985_s14 }
 0x153   :  { %v290_v60 = vpop.permute.xlu1 %289  ;;  %v1412_v45 = vpop.permute.xlu0 %471 }
 0x154   :  { %v295_v14 = vsel %vm293_vm8, %v1317_v3, %v290_v60  ;;  %v296_v26 = vsel %vm293_vm8, %v290_v60, %v1330_v11 }
 0x155   :  { %v301_v16 = vadd.f32 %v295_v14, %v271_v9  ;;  %v302_v17 = vadd.f32 %v296_v26, %v272_v10  ;;  %756 = vperm.xlu1 %924, %v753_v25  }
 0x157   :  { %v316_v50 = vpop.permute.xlu1 %315 }
 0x158   :  { %v324_v20 = vsel %vm323_vm9, %v316_v50, %v1338_v15 }
 0x159   :  { %v330_v21 = vadd.f32 %v324_v20, %v300_v32  ;;  %737 = vrot.lane.b32.xlu1 %v728_v37, %s986_s15 }
 0x15b   :  { %v320_v3 = vpop.permute.xlu1 %319 }
 0x15c   :  { %v325_v11 = vsel %vm323_vm9, %v1338_v15, %v320_v3  ;;  %v326_v24 = vsel %vm323_vm9, %v320_v3, %v1347_v41 }
 0x15d   :  { %v331_v29 = vadd.f32 %v325_v11, %v301_v16  ;;  %v332_v30 = vadd.f32 %v326_v24, %v302_v17  ;;  %741 = vrot.lane.b32.xlu1 %v730_v22, %s986_s15 }
 0x15f   :  { %v346_v31 = vpop.permute.xlu1 %345 }
 0x160   :  { %v354_v35 = vsel %vm353_vm10, %v346_v31, %v1354_v19 }
 0x161   :  { %v360_v39 = vadd.f32 %v354_v35, %v330_v21 }
 0x163   :  { %v350_v33 = vpop.permute.xlu1 %349 }
 0x164   :  { %v355_v27 = vsel %vm353_vm10, %v1354_v19, %v350_v33  ;;  %v356_v51 = vsel %vm353_vm10, %v350_v33, %v1362_v52  ;;  %v498_v19 = vpop.permute.xlu0 %497 }
 0x165   :  { %v361_v15 = vadd.f32 %v355_v27, %v331_v29  ;;  %v362_v43 = vadd.f32 %v356_v51, %v332_v30 }
 0x167   :  { %v376_v41 = vpop.permute.xlu1 %375 }
 0x168   :  { %v384_v44 = vsel %vm383_vm11, %v376_v41, %v1369_v57  ;;  %v502_v0 = vpop.permute.xlu0 %501 }
 0x169   :  { %v390_v36 = vadd.f32 %v384_v44, %v360_v39 }
 0x16b   :  { %v380_v48 = vpop.permute.xlu1 %379 }
 0x16c   :  { %v385_v53 = vsel %vm383_vm11, %v1369_v57, %v380_v48  ;;  %v386_v54 = vsel %vm383_vm11, %v380_v48, %v382_v47  ;;  %v528_v23 = vpop.permute.xlu0 %527 }
 0x16d   :  { %v391_v55 = vadd.f32 %v385_v53, %v361_v15  ;;  %v392_v56 = vadd.f32 %v386_v54, %v362_v43 }
 0x16f   :  { %v406_v40 = vpop.permute.xlu1 %405 }
 0x170   :  { %v414_v52 = vsel %vm413_vm12, %v406_v40, %v1383_v7  ;;  %v532_v9 = vpop.permute.xlu0 %531 }
 0x171   :  { %v420_v38 = vadd.f32 %v414_v52, %v390_v36 }
 0x173   :  { %v410_v58 = vpop.permute.xlu1 %409 }
 0x174   :  { %v415_v59 = vsel %vm413_vm12, %v1383_v7, %v410_v58  ;;  %v416_v61 = vsel %vm413_vm12, %v410_v58, %v412_v28  ;;  %v558_v12 = vpop.permute.xlu0 %557 }
 0x175   :  { %v421_v62 = vadd.f32 %v415_v59, %v391_v55  ;;  %v422_v63 = vadd.f32 %v416_v61, %v392_v56 }
 0x177   :  { %v436_v1 = vpop.permute.xlu1 %435 }
 0x178   :  { %v444_v2 = vsel %vm443_vm13, %v436_v1, %v438_v18  ;;  %v562_v13 = vpop.permute.xlu0 %561 }
 0x179   :  { %v450_v57 = vadd.f32 %v444_v2, %v420_v38 }
 0x17b   :  { %v440_v47 = vpop.permute.xlu1 %439 }
 0x17c   :  { %v445_v4 = vsel %vm443_vm13, %v438_v18, %v440_v47  ;;  %v446_v5 = vsel %vm443_vm13, %v440_v47, %v442_v34  ;;  %v588_v25 = vpop.permute.xlu0 %587 }
 0x17d   :  { %v451_v6 = vadd.f32 %v445_v4, %v421_v62  ;;  %v452_v49 = vadd.f32 %v446_v5, %v422_v63 }
 0x17f   :  { %v466_v8 = vpop.permute.xlu1 %465 }
 0x180   :  { %v592_v14 = vpop.permute.xlu0 %591  ;;  %v474_v31 = vsel %vm473_vm14, %v466_v8, %v1407_v42 }
 0x181   :  { %v480_v27 = vadd.f32 %v474_v31, %v450_v57 }
 0x183   :  { %v470_v10 = vpop.permute.xlu1 %469 }
 0x184   :  { %v618_v17 = vpop.permute.xlu0 %617  ;;  %v475_v35 = vsel %vm473_vm14, %v1407_v42, %v470_v10  ;;  %v476_v44 = vsel %vm473_vm14, %v470_v10, %v1412_v45 }
 0x185   :  { %v481_v51 = vadd.f32 %v475_v35, %v451_v6 }
 0x187   :  { %v496_v46 = vpop.permute.xlu1 %495 }
 0x188   :  { %v1417_v50 = vpop.permute.xlu0 %621  ;;  %v504_v39 = vsel %vm503_vm15, %v496_v46, %v498_v19 }
 0x189   :  { %v510_v36 = vadd.f32 %v504_v39, %v480_v27 }
 0x18b   :  { %v500_v7 = vpop.permute.xlu1 %499 }
 0x18c   :  { %v648_v21 = vpop.permute.xlu0 %647  ;;  %v505_v33 = vsel %vm503_vm15, %v498_v19, %v500_v7  ;;  %v506_v55 = vsel %vm503_vm15, %v500_v7, %v502_v0  ;;  %v482_v19 = vadd.f32 %v476_v44, %v452_v49 }
 0x18d   :  { %v511_v48 = vadd.f32 %v505_v33, %v481_v51 }
 0x18e   :  { %v512_v62 = vadd.f32 %v506_v55, %v482_v19 }
 0x18f   :  { %v526_v32 = vpop.permute.xlu1 %525 }
 0x190   :  { %v1419_v3 = vpop.permute.xlu0 %651  ;;  %v534_v43 = vsel %vm533_vm0, %v526_v32, %v528_v23 }
 0x191   :  { %v540_v56 = vadd.f32 %v534_v43, %v510_v36 }
 0x193   :  { %v530_v28 = vpop.permute.xlu1 %529 }
 0x194   :  { %v678_v24 = vpop.permute.xlu0 %677  ;;  %v535_v41 = vsel %vm533_vm0, %v528_v23, %v530_v28  ;;  %v536_v45 = vsel %vm533_vm0, %v530_v28, %v532_v9 }
 0x195   :  { %v541_v40 = vadd.f32 %v535_v41, %v511_v48  ;;  %v542_v23 = vadd.f32 %v536_v45, %v512_v62 }
 0x197   :  { %v556_v60 = vpop.permute.xlu1 %555 }
 0x198   :  { %v1423_v30 = vpop.permute.xlu0 %681  ;;  %v564_v42 = vsel %vm563_vm1, %v556_v60, %v558_v12 }
 0x199   :  { %v570_v59 = vadd.f32 %v564_v42, %v540_v56 }
 0x19b   :  { %v560_v26 = vpop.permute.xlu1 %559 }
 0x19c   :  { %v708_v15 = vpop.permute.xlu0 %707  ;;  %v565_v54 = vsel %vm563_vm1, %v558_v12, %v560_v26  ;;  %v566_v0 = vsel %vm563_vm1, %v560_v26, %v562_v13 }
 0x19d   :  { %v571_v61 = vadd.f32 %v565_v54, %v541_v40  ;;  %v572_v10 = vadd.f32 %v566_v0, %v542_v23 }
 0x19f   :  { %v586_v16 = vpop.permute.xlu1 %585 }
 0x1a0   :  { %v594_v52 = vsel %vm593_vm2, %v586_v16, %v588_v25  ;;  %v712_v58 = vpop.permute.xlu0 %711 }
 0x1a1   :  { %v600_v2 = vadd.f32 %v594_v52, %v570_v59 }
 0x1a3   :  { %v590_v37 = vpop.permute.xlu1 %589 }
 0x1a4   :  { %v595_v38 = vsel %vm593_vm2, %v588_v25, %v590_v37  ;;  %v736_v6 = vpop.permute.xlu0 %735  ;;  %v596_v49 = vsel %vm593_vm2, %v590_v37, %v592_v14 }
 0x1a5   :  { %v601_v57 = vadd.f32 %v595_v38, %v571_v61  ;;  %v602_v25 = vadd.f32 %v596_v49, %v572_v10 }
 0x1a7   :  { %v616_v18 = vpop.permute.xlu1 %615 }
 0x1a8   :  { %v624_v63 = vsel %vm623_vm3, %v616_v18, %v618_v17  ;;  %v740_v18 = vpop.permute.xlu0 %739 }
 0x1a9   :  { %v630_v8 = vadd.f32 %v624_v63, %v600_v2 }
 0x1ab   :  { %v620_v20 = vpop.permute.xlu1 %619 }
 0x1ac   :  { %v625_v1 = vsel %vm623_vm3, %v618_v17, %v620_v20  ;;  %v626_v7 = vsel %vm623_vm3, %v620_v20, %v1417_v50 }
 0x1ad   :  { %v631_v9 = vadd.f32 %v625_v1, %v601_v57  ;;  %v632_v37 = vadd.f32 %v626_v7, %v602_v25 }
 0x1af   :  { %v646_v22 = vpop.permute.xlu1 %645 }
 0x1b0   :  { %v654_v4 = vsel %vm653_vm4, %v646_v22, %v648_v21 }
 0x1b1   :  { %v660_v13 = vadd.f32 %v654_v4, %v630_v8 }
 0x1b3   :  { %v1421_v11 = vpop.permute.xlu1 %649 }
 0x1b4   :  { %v655_v5 = vsel %vm653_vm4, %v648_v21, %v1421_v11  ;;  %v656_v26 = vsel %vm653_vm4, %v1421_v11, %v1419_v3 }
 0x1b5   :  { %v661_v32 = vadd.f32 %v655_v5, %v631_v9 }
 0x1b7   :  { %v676_v29 = vpop.permute.xlu1 %675 }
 0x1b8   :  { %v684_v46 = vsel %vm683_vm5, %v676_v29, %v678_v24 }
 0x1b9   :  { %v690_v16 = vadd.f32 %v684_v46, %v660_v13 }
 0x1bb   :  { %v1425_v34 = vpop.permute.xlu1 %679 }
 0x1bc   :  { %v685_v12 = vsel %vm683_vm5, %v678_v24, %v1425_v34  ;;  %v686_v50 = vsel %vm683_vm5, %v1425_v34, %v1423_v30  ;;  %v662_v24 = vadd.f32 %v656_v26, %v632_v37 }
 0x1bd   :  { %v691_v17 = vadd.f32 %v685_v12, %v661_v32 }
 0x1be   :  { %v692_v39 = vadd.f32 %v686_v50, %v662_v24 }
 0x1bf   :  { %v706_v53 = vpop.permute.xlu1 %705 }
 0x1c0   :  { %v714_v60 = vsel %vm713_vm6, %v706_v53, %v708_v15 }
 0x1c1   :  { %v720_v20 = vadd.f32 %v714_v60, %v690_v16 }
 0x1c3   :  { %v710_v47 = vpop.permute.xlu1 %709 }
 0x1c4   :  { %v715_v14 = vsel %vm713_vm6, %v708_v15, %v710_v47  ;;  %v716_v35 = vsel %vm713_vm6, %v710_v47, %v712_v58 }
 0x1c5   :  { %v721_v21 = vadd.f32 %v715_v14, %v691_v17  ;;  %v722_v15 = vadd.f32 %v716_v35, %v692_v39 }
 0x1d0   :  { %v757_v28 = vpop.permute.xlu1 %756 }
 0x1d4   :  { %v738_v22 = vpop.permute.xlu1 %737 }
 0x1d5   :  { %v744_v29 = vsel %vm743_vm7, %v736_v6, %v738_v22  ;;  %v745_v31 = vsel %vm743_vm7, %v738_v22, %v740_v18 }
 0x1d6   :  { %v750_v3 = vadd.f32 %v744_v29, %v720_v20  ;;  %v751_v11 = vadd.f32 %v745_v31, %v721_v21 }
 0x1d8   :  { %v1463_v33 = vadd.f32 %v757_v28, %v750_v3  ;;  %v1465_v27 = vadd.f32 %v757_v28, %v751_v11  ;;  %v742_v51 = vpop.permute.xlu1 %741 }
 0x1d9   :  { %v746_v30 = vsel %vm743_vm7, %v740_v18, %v742_v51 }
 0x1da   :  { %v1469_v34 = vmul.f32 0.70710677, %v1463_v33  ;;  %v1472_v43 = vmul.f32 0.70710677, %v1465_v27  ;;  %v752_v41 = vadd.f32 %v746_v30, %v722_v15 }
 0x1dc   :  { %v768_v44 = vand.u32 2147483647, %v1469_v34  ;;  %v769_v36 = vand.u32 2147483647, %v1472_v43  ;;  %v1476_v48 = vadd.f32 %v757_v28, %v752_v41  ;;  %vm828_vm8 = vcmp.ge.f32.partialorder %v1469_v34, 0.0 }
 0x1dd   :  { %vm829_vm9 = vcmp.ge.f32.partialorder %v1472_v43, 0.0 }
 0x1de   :  { %v771_v53 = vmul.f32 0.3275911, %v768_v44  ;;  %v772_v42 = vmul.f32 0.3275911, %v769_v36  ;;  %v1479_v54 = vmul.f32 0.70710677, %v1476_v48 }
 0x1df   :  { %v810_v38 = vsub.f32 0.0, %v768_v44  ;;  %v811_v58 = vsub.f32 0.0, %v769_v36 }
 0x1e0   :  { %v774_v55 = vadd.f32 1.0, %v771_v53  ;;  %v775_v56 = vadd.f32 1.0, %v772_v42  ;;  %v770_v40 = vand.u32 2147483647, %v1479_v54  ;;  %vm830_vm10 = vcmp.ge.f32.partialorder %v1479_v54, 0.0 }
 0x1e1   :  { %v813_v45 = vmul.f32 %v810_v38, %v768_v44  ;;  %v814_v59 = vmul.f32 %v811_v58, %v769_v36  ;;  %v762_v36 = vmul.f32 0.5, %v1463_v33  ;;  %v764_v33 = vmul.f32 0.5, %v1476_v48 }
 0x1e2   :  { %926 = vrcp.f32 %v774_v55  ;;  %v773_v19 = vmul.f32 0.3275911, %v770_v40  ;;  %v812_v61 = vsub.f32 0.0, %v770_v40 }
 0x1e3   :  { %928 = vrcp.f32 %v775_v56  ;;  %v816_v0 = vmul.f32 1.442695, %v813_v45  ;;  %v818_v57 = vmul.f32 1.442695, %v814_v59  ;;  %v763_v56 = vmul.f32 0.5, %v1465_v27 }
 0x1e4   :  { %v776_v52 = vadd.f32 1.0, %v773_v19  ;;  %v815_v47 = vmul.f32 %v812_v61, %v770_v40 }
 0x1e6   :  { %930 = vrcp.f32 %v776_v52  ;;  %v820_v9 = vmul.f32 1.442695, %v815_v47 }
 0x1e7   :  { %932 = vpow2.f32 %v816_v0 }
 0x1e8   :  { %934 = vpow2.f32 %v818_v57 }
 0x1e9   :  { %936 = vpow2.f32 %v820_v9 }
 0x1ef   :  { %v927_v62 = vpop.eup %926 }
 0x1f0   :  { %v929_v63 = vpop.eup %928  ;;  %v783_v1 = vmul.f32 1.0614054, %v927_v62 }
 0x1f1   :  { %v784_v2 = vmul.f32 1.0614054, %v929_v63 }
 0x1f2   :  { %v786_v23 = vadd.f32 -1.4531521, %v783_v1 }
 0x1f3   :  { %v787_v4 = vadd.f32 -1.4531521, %v784_v2  ;;  %v931_v5 = vpop.eup %930 }
 0x1f4   :  { %v789_v6 = vmul.f32 %v927_v62, %v786_v23  ;;  %v785_v8 = vmul.f32 1.0614054, %v931_v5  ;;  %v933_v20 = vpop.eup %932 }
 0x1f5   :  { %v790_v49 = vmul.f32 %v929_v63, %v787_v4  ;;  %v935_v24 = vpop.eup %934 }
 0x1f6   :  { %v792_v10 = vadd.f32 1.4214138, %v789_v6  ;;  %v788_v12 = vadd.f32 -1.4531521, %v785_v8  ;;  %v937_v51 = vpop.eup %936 }
 0x1f7   :  { %v793_v46 = vadd.f32 1.4214138, %v790_v49 }
 0x1f8   :  { %v795_v7 = vmul.f32 %v927_v62, %v792_v10  ;;  %v791_v32 = vmul.f32 %v931_v5, %v788_v12 }
 0x1f9   :  { %v796_v13 = vmul.f32 %v929_v63, %v793_v46 }
 0x1fa   :  { %v798_v28 = vadd.f32 -0.28449672, %v795_v7  ;;  %v794_v60 = vadd.f32 1.4214138, %v791_v32 }
 0x1fb   :  { %v799_v25 = vadd.f32 -0.28449672, %v796_v13 }
 0x1fc   :  { %v801_v14 = vmul.f32 %v927_v62, %v798_v28  ;;  %v797_v16 = vmul.f32 %v931_v5, %v794_v60 }
 0x1fd   :  { %v802_v26 = vmul.f32 %v929_v63, %v799_v25 }
 0x1fe   :  { %v804_v17 = vadd.f32 0.2548296, %v801_v14  ;;  %v800_v18 = vadd.f32 -0.28449672, %v797_v16 }
 0x1ff   :  { %v805_v37 = vadd.f32 0.2548296, %v802_v26 }
 0x200   :  { %v807_v50 = vmul.f32 %v927_v62, %v804_v17  ;;  %v803_v22 = vmul.f32 %v931_v5, %v800_v18 }
 0x201   :  { %v808_v21 = vmul.f32 %v929_v63, %v805_v37 }
 0x202   :  { %v822_v29 = vmul.f32 %v933_v20, %v807_v50  ;;  %v806_v35 = vadd.f32 0.2548296, %v803_v22 }
 0x203   :  { %v823_v31 = vmul.f32 %v935_v24, %v808_v21 }
 0x204   :  { %v825_v3 = vsub.f32 1.0, %v822_v29  ;;  %v809_v39 = vmul.f32 %v931_v5, %v806_v35 }
 0x205   :  { %v826_v11 = vsub.f32 1.0, %v823_v31 }
 0x206   :  { %v831_v15 = vsub.f32 0.0, %v825_v3  ;;  %v824_v41 = vmul.f32 %v937_v51, %v809_v39 }
 0x207   :  { %v832_v30 = vsub.f32 0.0, %v826_v11 }
 0x208   :  { %v834_v44 = vsel %vm828_vm8, %v825_v3, %v831_v15  ;;  %v827_v55 = vsub.f32 1.0, %v824_v41 }
 0x209   :  { %v835_v53 = vsel %vm829_vm9, %v826_v11, %v832_v30  ;;  %v837_v42 = vadd.f32 1.0, %v834_v44 }
 0x20a   :  { %v838_v40 = vadd.f32 1.0, %v835_v53  ;;  %v833_v52 = vsub.f32 0.0, %v827_v55 }
 0x20b   :  { %v840_v19 = vmul.f32 %v837_v42, %v762_v36 }
 0x20c   :  { %v841_v38 = vmul.f32 %v838_v40, %v763_v56  ;;  %v836_v34 = vsel %vm830_vm10, %v827_v55, %v833_v52 }
 0x20d   :  { %843 = vst [vmem:[%s1500_s3] sm:$0xff] %v840_v19  ;;  %v839_v43 = vadd.f32 1.0, %v836_v34 }
 0x20e   :  { %844 = vst [vmem:[%s1500_s3 + $0x8] sm:$0xff] %v841_v38 }
 0x20f   :  { %v842_v58 = vmul.f32 %v839_v43, %v764_v33 }
 0x211   :  { %845 = vst [vmem:[%s1500_s3 + $0x10] sm:$0xff] %v842_v58 }

// kernel: fdsm_forward.9
= control target key start
LH: loop header
LB: loop body
LE: loop exit
PB: predicated region body
PF: predicated region fallthrough
CT: control target
= control target key end

     0   :  { %s529_s15 = smov 0   ;;  %s531_s16 = smov 0   ;;  %s577_s0 = inlined_call_operand.vmem [shape: bf16[2,16,256], index: 0, kind: input, shape index: {}]   ;;  %s578_s1 = inlined_call_operand.vmem [shape: bf16[16,16], index: 1, kind: input, shape index: {}]   ;;  %s579_s2 = inlined_call_operand.vmem [shape: f32[16,1], index: 2, kind: input, shape index: {}]   ;;  %s580_s3 = inlined_call_operand.vmem [shape: f32[16,1], index: 3, kind: input, shape index: {}]   ;;  %s581_s4 = inlined_call_operand.vmem [shape: f32[2,16,256], index: 4, kind: output, shape index: {}]  }
   0x1   :  { %s533_s17 = smov 0  }
   0x2 LB: > { %s26_s18 = sadd.s32 1, %s497_s16  ;;  %p435_p0 = scmp.ge.s32.totalorder %s501_s17, 1  ;;  %s501_s17 = sphi %s533_s17, %s14_s17   ;;  %s497_s16 = sphi %s531_s16, %s583_s16   ;;  %s493_s15 = sphi %s529_s15, %s582_s15  }
   0x3   : > { %p28_p1 = scmp.ge.s32.totalorder %s26_s18, 2  ;;  %p183_p2 = scmp.lt.s32.totalorder %s501_s17, 3 }
   0x5   : > { %s585_s18 = smov (%p28_p1, %s26_s18), 0  ;;  %p184_p3 = pnand %p435_p0, %p183_p2 }
   0x6   : > { %p218_p4 = scmp.lt.s32.totalorder (!%p184_p3), %s493_s15, 1 }
   0x7   : > { %187 = sbr.rel (%p184_p3) target bundleno = 226 (0xe2), region = 36 }
   0xc   : > { %v503_v0 = vmov 0   ;;  %v304_v1 = vld [vmem:[%s579_s2] sm:$0xff]  ;;  %s587_s15 = smov (!%p218_p4, %s493_s15), 1  ;;  %v305_v3 = vld [vmem:[%s579_s2 + $0x8] sm:$0xff]  ;;  %vm257_vm0 = vcmask 130048  }
   0xd   : > { %293 = vmatprep.mubr.bf16.mxu0 %v503_v0  ;;  %473 = vset.pattern.permute.xlu0 %v503_v0  ;;  %v320_v2 = vld [vmem:[%s580_s3] sm:$0xff]  ;;  %s446_s25 = sshll.u32 %s587_s15, 4  ;;  %v321_v4 = vld [vmem:[%s580_s3 + $0x8] sm:$0xff]  ;;  %s447_s7 = sshll.u32 %s587_s15, 5 }
   0xe   : > { %308 = vperm.xlu0 %473, %v304_v1   ;;  %474 = vset.pattern.permute.xlu1 %v503_v0  ;;  %s225_s30 = scalar_lea.vmem %s577_s0, %s446_s25  ;;  %v478_v7 = vld [vmem:[%s578_s1] sm:$0xff]   ;;  %s235_s10 = scalar_lea.vmem %s581_s4, %s447_s7 }
   0xf   : > { %324 = vperm.xlu1 %474, %v320_v2   ;;  %v475_v5 = vld [vmem:[%s225_s30 + $0x4] ss:$8 sps:$4 sm:$0xff]   ;;  %v477_v6 = vld [vmem:[%s225_s30] ss:$8 sps:$4 sm:$0xff]  }
  0x10   : > { %275 = vmatprep.subr.bf16.mxu0 %v475_v5 }
  0x11   : > { %276 = vmatpush1.bf16.msra.mxu0 %v477_v6 }
  0x12   : > { %313 = vperm.xlu0 %473, %v305_v3  }
  0x13   : > { %329 = vperm.xlu1 %474, %v321_v4  }
  0x14   : > { %443 = vmatmul.mubr.msk.bf16.vlgmr.msra.gmra.mxu0 %vm257_vm0, %v478_v7 }
  0x89   : > { %v309_v8 = vpop.permute.xlu0 %308 }
  0x8a   : > { %v325_v9 = vpop.permute.xlu1 %324 }
  0x8d   : > { %v314_v15 = vpop.permute.xlu0 %313 }
  0x8e   : > { %v330_v20 = vpop.permute.xlu1 %329 }
  0xd4   : > { %v295_v10 = vpop.f32.mrf.mxu0 }
  0xd5   : > { %v316_v11 = vmul.f32 %v309_v8, %v295_v10 }
  0xd6   : > { %v297_v12 = vpop.f32.mrf.mxu0 }
  0xd7   : > { %v332_v13 = vadd.f32 %v325_v9, %v316_v11  ;;  %v317_v14 = vmul.f32 %v309_v8, %v297_v12 }
  0xd8   : > { %v299_v16 = vpop.f32.mrf.mxu0 }
  0xd9   : > { %v336_v17 = vmax.f32 %v332_v13, 0.0  ;;  %v333_v18 = vadd.f32 %v325_v9, %v317_v14  ;;  %v318_v19 = vmul.f32 %v314_v15, %v299_v16 }
  0xda   : > { %v301_v21 = vpop.f32.mrf.mxu0 }
  0xdb   : > { %340 = vst [vmem:[%s235_s10] sm:$0xff] %v336_v17  ;;  %v337_v22 = vmax.f32 %v333_v18, 0.0  ;;  %v334_v23 = vadd.f32 %v330_v20, %v318_v19  ;;  %v319_v24 = vmul.f32 %v314_v15, %v301_v21 }
  0xdd   : > { %341 = vst [vmem:[%s235_s10 + $0x8] sm:$0xff] %v337_v22  ;;  %v338_v25 = vmax.f32 %v334_v23, 0.0  ;;  %v335_v26 = vadd.f32 %v330_v20, %v319_v24 }
  0xdf   : > { %342 = vst [vmem:[%s235_s10 + $0x10] sm:$0xff] %v338_v25  ;;  %v339_v27 = vmax.f32 %v335_v26, 0.0 }
  0xe1   : > { %343 = vst [vmem:[%s235_s10 + $0x18] sm:$0xff] %v339_v27 }
  0xe2 PF: > { %s14_s17 = sadd.s32 1, %s501_s17   ;;  %s582_s15 = smov %s497_s16 }
  0xe3   : > { %p11_p5 = scmp.ge.s32.totalorder %s14_s17, 4   ;;  %s583_s16 = smov %s585_s18 }
  0xe5   :  { %13 = sbr.rel (!%p11_p5) target bundleno = 2 (0x2), region = 66 }

// kernel: fdsm_forward.8
= control target key start
LH: loop header
LB: loop body
LE: loop exit
PB: predicated region body
PF: predicated region fallthrough
CT: control target
= control target key end

     0   :  { %s513_s12 = smov 0   ;;  %s515_s13 = smov 0   ;;  %s552_s0 = inlined_call_operand.vmem [shape: bf16[2,16,256], index: 0, kind: input, shape index: {}]   ;;  %s553_s1 = inlined_call_operand.vmem [shape: bf16[16,16], index: 1, kind: input, shape index: {}]   ;;  %s554_s2 = inlined_call_operand.vmem [shape: f32[2,16,1], index: 2, kind: output, shape index: {0}]   ;;  %s555_s3 = inlined_call_operand.vmem [shape: f32[2,16,1], index: 3, kind: output, shape index: {1}]  }
   0x1   :  { %s517_s14 = smov 0  }
   0x2 LB: > { %s26_s15 = sadd.s32 1, %s486_s13  ;;  %p423_p0 = scmp.ge.s32.totalorder %s490_s14, 1  ;;  %s490_s14 = sphi %s517_s14, %s14_s14   ;;  %s486_s13 = sphi %s515_s13, %s557_s13   ;;  %s482_s12 = sphi %s513_s12, %s556_s12  }
   0x3   : > { %p28_p1 = scmp.ge.s32.totalorder %s26_s15, 2  ;;  %p163_p2 = scmp.lt.s32.totalorder %s490_s14, 3 }
   0x5   : > { %s559_s15 = smov (%p28_p1, %s26_s15), 0  ;;  %p164_p3 = pnand %p423_p0, %p163_p2 }
   0x6   : > { %p199_p4 = scmp.lt.s32.totalorder (!%p164_p3), %s482_s12, 1 }
   0x7   : > { %167 = sbr.rel (%p164_p3) target bundleno = 362 (0x16a), region = 28 }
   0xc   : > { %v492_v0 = vmov 0   ;;  %s561_s12 = smov (!%p199_p4, %s482_s12), 1  ;;  %v467_v3 = vld [vmem:[%s553_s1] sm:$0xff]   ;;  %vm242_vm0 = vcmask 130048   ;;  %vm295_vm1 = vcmask 7168  }
   0xd   : > { %278 = vmatprep.mubr.bf16.mxu0 %v492_v0  ;;  %s436_s16 = sshll.u32 %s561_s12, 4 }
   0xe   : > { %s206_s19 = scalar_lea.vmem %s552_s0, %s436_s16  ;;  %s213_s24 = scalar_lea.vmem %s554_s2, %s436_s16 }
   0xf   : > { %v464_v1 = vld [vmem:[%s206_s19 + $0x4] ss:$8 sps:$4 sm:$0xff]   ;;  %v466_v2 = vld [vmem:[%s206_s19] ss:$8 sps:$4 sm:$0xff]   ;;  %s220_s27 = scalar_lea.vmem %s555_s3, %s436_s16 }
  0x10   : > { %260 = vmatprep.subr.bf16.mxu0 %v464_v1 }
  0x11   : > { %261 = vmatpush1.bf16.msra.mxu0 %v466_v2 }
  0x14   : > { %433 = vmatmul.mubr.msk.bf16.vlgmr.msra.gmra.mxu0 %vm242_vm0, %v467_v3 }
  0xd4   : > { %v280_v4 = vpop.f32.mrf.mxu0 }
  0xd5   : > { %v298_v6 = vmul.f32 %v280_v4, %v280_v4 }
  0xd6   : > { %v282_v5 = vpop.f32.mrf.mxu0 }
  0xd7   : > { %v299_v7 = vmul.f32 %v282_v5, %v282_v5  ;;  %v289_v8 = vadd.f32 %v282_v5, %v280_v4 }
  0xd8   : > { %v284_v9 = vpop.f32.mrf.mxu0 }
  0xd9   : > { %290 = vadd.xlane.f32.xlu0 %v289_v8  ;;  %v302_v10 = vadd.f32 %v299_v7, %v298_v6  ;;  %v300_v12 = vmul.f32 %v284_v9, %v284_v9 }
  0xda   : > { %v286_v11 = vpop.f32.mrf.mxu0 }
  0xdb   : > { %v292_v13 = vadd.f32 %v286_v11, %v284_v9  ;;  %v301_v14 = vmul.f32 %v286_v11, %v286_v11  ;;  %303 = vadd.xlane.f32.xlu1 %v302_v10 }
  0xdd   : > { %293 = vadd.xlane.f32.xlu0 %v292_v13  ;;  %v305_v15 = vadd.f32 %v301_v14, %v300_v12 }
  0xdf   : > { %306 = vadd.xlane.f32.xlu1 %v305_v15 }
 0x162   : > { %v291_v16 = vpop.xlane.xlu0 %290 }
 0x163   : > { %296 = vst.msk [vmem:[%s213_s24] sm:$0xff] %vm295_vm1, %v291_v16 }
 0x164   : > { %v304_v17 = vpop.xlane.xlu1 %303 }
 0x165   : > { %308 = vst.msk [vmem:[%s220_s27] sm:$0xff] %vm295_vm1, %v304_v17 }
 0x166   : > { %v294_v18 = vpop.xlane.xlu0 %293 }
 0x167   : > { %297 = vst.msk [vmem:[%s213_s24 + $0x8] sm:$0xff] %vm295_vm1, %v294_v18 }
 0x168   : > { %v307_v19 = vpop.xlane.xlu1 %306 }
 0x169   : > { %309 = vst.msk [vmem:[%s220_s27 + $0x8] sm:$0xff] %vm295_vm1, %v307_v19 }
 0x16a PF: > { %s14_s14 = sadd.s32 1, %s490_s14   ;;  %s556_s12 = smov %s486_s13 }
 0x16b   : > { %p11_p5 = scmp.ge.s32.totalorder %s14_s14, 4   ;;  %s557_s13 = smov %s559_s15 }
 0x16d   :  { %13 = sbr.rel (!%p11_p5) target bundleno = 2 (0x2), region = 70 }

// kernel: reverse.1
= control target key start
LH: loop header
LB: loop body
LE: loop exit
PB: predicated region body
PF: predicated region fallthrough
CT: control target
= control target key end

     0   :  { %v104_v3 = vlaneseq  ;;  %v97_v18 = vld [vmem:[#allocation0 + $0x7] ss:$-1 sm:$0xff]  ;;  %v111_v19 = vld [vmem:[#allocation0 + $0x17] ss:$-1 sm:$0xff]  ;;  %s606_s0 = inlined_call_operand.vmem [shape: f32[2,8,16,7], index: 0, kind: input, shape index: {}]   ;;  %s607_s1 = inlined_call_operand.vmem [shape: f32[2,8,16,7], index: 1, kind: output, shape index: {}]  }
   0x1   :  { %v61_v0 = vld [vmem:[%s606_s0] sm:$0xff]  ;;  %v63_v1 = vld [vmem:[%s606_s0 + $0x8] sm:$0xff]  ;;  %v65_v2 = vld [vmem:[%s606_s0 + $0x10] sm:$0xff]  ;;  %v98_v20 = vrot.slane %v97_v18, 1  ;;  %v112_v21 = vrot.slane %v111_v19, 1 }
   0x2   :  { %62 = vst [vmem:[#allocation0 + $0x8] sm:$0xff] %v61_v0  ;;  %64 = vst [vmem:[#allocation0 + $0x18] sm:$0xff] %v63_v1  ;;  %v67_v4 = vld [vmem:[%s606_s0 + $0x18] sm:$0xff]  ;;  %v69_v5 = vld [vmem:[%s606_s0 + $0x20] sm:$0xff]  ;;  %v502_v10 = vshrl.u32 %v104_v3, 7 }
   0x3   :  { %66 = vst [vmem:[#allocation0 + $0x28] sm:$0xff] %v65_v2  ;;  %v71_v6 = vld [vmem:[%s606_s0 + $0x28] sm:$0xff]  ;;  %68 = vst [vmem:[#allocation0 + $0x38] sm:$0xff] %v67_v4  ;;  %v73_v7 = vld [vmem:[%s606_s0 + $0x30] sm:$0xff] }
   0x4   :  { %70 = vst [vmem:[#allocation0 + $0x48] sm:$0xff] %v69_v5  ;;  %72 = vst [vmem:[#allocation0 + $0x58] sm:$0xff] %v71_v6  ;;  %v75_v8 = vld [vmem:[%s606_s0 + $0x38] sm:$0xff]  ;;  %v77_v9 = vld [vmem:[%s606_s0 + $0x40] sm:$0xff]  ;;  %vm106_vm0 = vcmp.lt.s32.totalorder %v502_v10, 7 }
   0x5   :  { %74 = vst [vmem:[#allocation0 + $0x68] sm:$0xff] %v73_v7  ;;  %76 = vst [vmem:[#allocation0 + $0x78] sm:$0xff] %v75_v8  ;;  %v79_v11 = vld [vmem:[%s606_s0 + $0x48] sm:$0xff]  ;;  %v81_v12 = vld [vmem:[%s606_s0 + $0x50] sm:$0xff] }
   0x6   :  { %78 = vst [vmem:[#allocation0 + $0x88] sm:$0xff] %v77_v9  ;;  %v83_v13 = vld [vmem:[%s606_s0 + $0x58] sm:$0xff]  ;;  %80 = vst [vmem:[#allocation0 + $0x98] sm:$0xff] %v79_v11  ;;  %v85_v14 = vld [vmem:[%s606_s0 + $0x60] sm:$0xff] }
   0x7   :  { %82 = vst [vmem:[#allocation0 + $0xa8] sm:$0xff] %v81_v12  ;;  %84 = vst [vmem:[#allocation0 + $0xb8] sm:$0xff] %v83_v13  ;;  %v87_v15 = vld [vmem:[%s606_s0 + $0x68] sm:$0xff]  ;;  %v89_v16 = vld [vmem:[%s606_s0 + $0x70] sm:$0xff] }
   0x8   :  { %86 = vst [vmem:[#allocation0 + $0xc8] sm:$0xff] %v85_v14  ;;  %88 = vst [vmem:[#allocation0 + $0xd8] sm:$0xff] %v87_v15  ;;  %v91_v17 = vld [vmem:[%s606_s0 + $0x78] sm:$0xff]  ;;  %v125_v22 = vld [vmem:[#allocation0 + $0x27] ss:$-1 sm:$0xff] }
   0x9   :  { %90 = vst [vmem:[#allocation0 + $0xe8] sm:$0xff] %v89_v16  ;;  %92 = vst [vmem:[#allocation0 + $0xf8] sm:$0xff] %v91_v17  ;;  %v139_v23 = vld [vmem:[#allocation0 + $0x37] ss:$-1 sm:$0xff]  ;;  %v126_v24 = vrot.slane %v125_v22, 1 }
   0xa   :  { %v140_v25 = vrot.slane %v139_v23, 1  ;;  %v153_v26 = vld [vmem:[#allocation0 + $0x47] ss:$-1 sm:$0xff]  ;;  %v167_v27 = vld [vmem:[#allocation0 + $0x57] ss:$-1 sm:$0xff]  ;;  %99 = vst [vmem:[#allocation1] sm:$0xff] %v98_v20 }
   0xb   :  { %v102_v28 = vld [vmem:[#allocation0 + $0xf] ss:$-1 sm:$0xff]  ;;  %113 = vst [vmem:[#allocation1 + $0x8] sm:$0xff] %v112_v21  ;;  %v116_v29 = vld [vmem:[#allocation0 + $0x1f] ss:$-1 sm:$0xff]  ;;  %127 = vst [vmem:[#allocation1 + $0x10] sm:$0xff] %v126_v24 }
   0xc   :  { %v130_v30 = vld [vmem:[#allocation0 + $0x2f] ss:$-1 sm:$0xff]  ;;  %v103_v31 = vrot.slane %v102_v28, 1  ;;  %v117_v32 = vrot.slane %v116_v29, 1  ;;  %141 = vst [vmem:[#allocation1 + $0x18] sm:$0xff] %v140_v25  ;;  %v154_v35 = vrot.slane %v153_v26, 1 }
   0xd   :  { %v131_v33 = vrot.slane %v130_v30, 1  ;;  %v144_v34 = vld [vmem:[#allocation0 + $0x3f] ss:$-1 sm:$0xff]  ;;  %v158_v37 = vld [vmem:[#allocation0 + $0x4f] ss:$-1 sm:$0xff]  ;;  %v168_v38 = vrot.slane %v167_v27, 1 }
   0xe   :  { %v145_v36 = vrot.slane %v144_v34, 1  ;;  %v172_v39 = vld [vmem:[#allocation0 + $0x5f] ss:$-1 sm:$0xff]  ;;  %107 = vst.msk [vmem:[#allocation1] sm:$0xff] %vm106_vm0, %v103_v31  ;;  %121 = vst.msk [vmem:[#allocation1 + $0x8] sm:$0xff] %vm106_vm0, %v117_v32  ;;  %v159_v40 = vrot.slane %v158_v37, 1 }
   0xf   :  { %135 = vst.msk [vmem:[#allocation1 + $0x10] sm:$0xff] %vm106_vm0, %v131_v33  ;;  %155 = vst [vmem:[#allocation1 + $0x20] sm:$0xff] %v154_v35  ;;  %v173_v41 = vrot.slane %v172_v39, 1  ;;  %v181_v42 = vld [vmem:[#allocation0 + $0x67] ss:$-1 sm:$0xff] }
  0x10   :  { %v186_v43 = vld [vmem:[#allocation0 + $0x6f] ss:$-1 sm:$0xff]  ;;  %149 = vst.msk [vmem:[#allocation1 + $0x18] sm:$0xff] %vm106_vm0, %v145_v36  ;;  %169 = vst [vmem:[#allocation1 + $0x28] sm:$0xff] %v168_v38  ;;  %v182_v44 = vrot.slane %v181_v42, 1 }
  0x11   :  { %v187_v45 = vrot.slane %v186_v43, 1  ;;  %v195_v46 = vld [vmem:[#allocation0 + $0x77] ss:$-1 sm:$0xff]  ;;  %v200_v47 = vld [vmem:[#allocation0 + $0x7f] ss:$-1 sm:$0xff]  ;;  %163 = vst.msk [vmem:[#allocation1 + $0x20] sm:$0xff] %vm106_vm0, %v159_v40 }
  0x12   :  { %177 = vst.msk [vmem:[#allocation1 + $0x28] sm:$0xff] %vm106_vm0, %v173_v41  ;;  %v196_v48 = vrot.slane %v195_v46, 1  ;;  %v201_v49 = vrot.slane %v200_v47, 1  ;;  %v209_v50 = vld [vmem:[#allocation0 + $0x87] ss:$-1 sm:$0xff]  ;;  %183 = vst [vmem:[#allocation1 + $0x30] sm:$0xff] %v182_v44 }
  0x13   :  { %v214_v51 = vld [vmem:[#allocation0 + $0x8f] ss:$-1 sm:$0xff]  ;;  %v210_v52 = vrot.slane %v209_v50, 1  ;;  %v223_v54 = vld [vmem:[#allocation0 + $0x97] ss:$-1 sm:$0xff]  ;;  %191 = vst.msk [vmem:[#allocation1 + $0x30] sm:$0xff] %vm106_vm0, %v187_v45 }
  0x14   :  { %v215_v53 = vrot.slane %v214_v51, 1  ;;  %v228_v55 = vld [vmem:[#allocation0 + $0x9f] ss:$-1 sm:$0xff]  ;;  %197 = vst [vmem:[#allocation1 + $0x38] sm:$0xff] %v196_v48  ;;  %v224_v56 = vrot.slane %v223_v54, 1 }
  0x15   :  { %v229_v57 = vrot.slane %v228_v55, 1  ;;  %v237_v58 = vld [vmem:[#allocation0 + $0xa7] ss:$-1 sm:$0xff]  ;;  %v242_v59 = vld [vmem:[#allocation0 + $0xaf] ss:$-1 sm:$0xff]  ;;  %205 = vst.msk [vmem:[#allocation1 + $0x38] sm:$0xff] %vm106_vm0, %v201_v49 }
  0x16   :  { %211 = vst [vmem:[#allocation1 + $0x40] sm:$0xff] %v210_v52  ;;  %v238_v60 = vrot.slane %v237_v58, 1  ;;  %v243_v61 = vrot.slane %v242_v59, 1  ;;  %v251_v62 = vld [vmem:[#allocation0 + $0xb7] ss:$-1 sm:$0xff]  ;;  %225 = vst [vmem:[#allocation1 + $0x48] sm:$0xff] %v224_v56 }
  0x17   :  { %v256_v63 = vld [vmem:[#allocation0 + $0xbf] ss:$-1 sm:$0xff]  ;;  %219 = vst.msk [vmem:[#allocation1 + $0x40] sm:$0xff] %vm106_vm0, %v215_v53  ;;  %v252_v0 = vrot.slane %v251_v62, 1  ;;  %v265_v2 = vld [vmem:[#allocation0 + $0xc7] ss:$-1 sm:$0xff] }
  0x18   :  { %v257_v1 = vrot.slane %v256_v63, 1  ;;  %v270_v3 = vld [vmem:[#allocation0 + $0xcf] ss:$-1 sm:$0xff]  ;;  %233 = vst.msk [vmem:[#allocation1 + $0x48] sm:$0xff] %vm106_vm0, %v229_v57  ;;  %239 = vst [vmem:[#allocation1 + $0x50] sm:$0xff] %v238_v60  ;;  %v266_v4 = vrot.slane %v265_v2, 1 }
  0x19   :  { %v271_v5 = vrot.slane %v270_v3, 1  ;;  %v279_v6 = vld [vmem:[#allocation0 + $0xd7] ss:$-1 sm:$0xff]  ;;  %v284_v7 = vld [vmem:[#allocation0 + $0xdf] ss:$-1 sm:$0xff]  ;;  %247 = vst.msk [vmem:[#allocation1 + $0x50] sm:$0xff] %vm106_vm0, %v243_v61 }
  0x1a   :  { %253 = vst [vmem:[#allocation1 + $0x58] sm:$0xff] %v252_v0  ;;  %v280_v8 = vrot.slane %v279_v6, 1  ;;  %v285_v9 = vrot.slane %v284_v7, 1  ;;  %v293_v11 = vld [vmem:[#allocation0 + $0xe7] ss:$-1 sm:$0xff]  ;;  %267 = vst [vmem:[#allocation1 + $0x60] sm:$0xff] %v266_v4 }
  0x1b   :  { %v298_v12 = vld [vmem:[#allocation0 + $0xef] ss:$-1 sm:$0xff]  ;;  %261 = vst.msk [vmem:[#allocation1 + $0x58] sm:$0xff] %vm106_vm0, %v257_v1  ;;  %v294_v13 = vrot.slane %v293_v11, 1  ;;  %v307_v15 = vld [vmem:[#allocation0 + $0xf7] ss:$-1 sm:$0xff] }
  0x1c   :  { %v299_v14 = vrot.slane %v298_v12, 1  ;;  %v312_v16 = vld [vmem:[#allocation0 + $0xff] ss:$-1 sm:$0xff]  ;;  %275 = vst.msk [vmem:[#allocation1 + $0x60] sm:$0xff] %vm106_vm0, %v271_v5  ;;  %281 = vst [vmem:[#allocation1 + $0x68] sm:$0xff] %v280_v8  ;;  %v308_v17 = vrot.slane %v307_v15, 1 }
  0x1d   :  { %v313_v18 = vrot.slane %v312_v16, 1  ;;  %v376_v19 = vld [vmem:[#allocation1] sm:$0xff]  ;;  %v378_v20 = vld [vmem:[#allocation1 + $0x8] sm:$0xff]  ;;  %v380_v21 = vld [vmem:[#allocation1 + $0x10] sm:$0xff]  ;;  %289 = vst.msk [vmem:[#allocation1 + $0x68] sm:$0xff] %vm106_vm0, %v285_v9 }
  0x1e   :  { %295 = vst [vmem:[#allocation1 + $0x70] sm:$0xff] %v294_v13  ;;  %377 = vst [vmem:[%s607_s1] sm:$0xff] %v376_v19  ;;  %v382_v22 = vld [vmem:[#allocation1 + $0x18] sm:$0xff]  ;;  %v384_v23 = vld [vmem:[#allocation1 + $0x20] sm:$0xff] }
  0x1f   :  { %379 = vst [vmem:[%s607_s1 + $0x8] sm:$0xff] %v378_v20  ;;  %381 = vst [vmem:[%s607_s1 + $0x10] sm:$0xff] %v380_v21  ;;  %v386_v24 = vld [vmem:[#allocation1 + $0x28] sm:$0xff]  ;;  %v388_v25 = vld [vmem:[#allocation1 + $0x30] sm:$0xff] }
  0x20   :  { %303 = vst.msk [vmem:[#allocation1 + $0x70] sm:$0xff] %vm106_vm0, %v299_v14  ;;  %309 = vst [vmem:[#allocation1 + $0x78] sm:$0xff] %v308_v17  ;;  %v390_v26 = vld [vmem:[#allocation1 + $0x38] sm:$0xff]  ;;  %v392_v10 = vld [vmem:[#allocation1 + $0x40] sm:$0xff] }
  0x21   :  { %383 = vst [vmem:[%s607_s1 + $0x18] sm:$0xff] %v382_v22  ;;  %385 = vst [vmem:[%s607_s1 + $0x20] sm:$0xff] %v384_v23  ;;  %v394_v27 = vld [vmem:[#allocation1 + $0x48] sm:$0xff]  ;;  %v396_v28 = vld [vmem:[#allocation1 + $0x50] sm:$0xff] }
  0x22   :  { %387 = vst [vmem:[%s607_s1 + $0x28] sm:$0xff] %v386_v24  ;;  %317 = vst.msk [vmem:[#allocation1 + $0x78] sm:$0xff] %vm106_vm0, %v313_v18  ;;  %v398_v29 = vld [vmem:[#allocation1 + $0x58] sm:$0xff] }
  0x23   :  { %389 = vst [vmem:[%s607_s1 + $0x30] sm:$0xff] %v388_v25  ;;  %391 = vst [vmem:[%s607_s1 + $0x38] sm:$0xff] %v390_v26  ;;  %v400_v30 = vld [vmem:[#allocation1 + $0x60] sm:$0xff] }
  0x24   :  { %393 = vst [vmem:[%s607_s1 + $0x40] sm:$0xff] %v392_v10  ;;  %395 = vst [vmem:[%s607_s1 + $0x48] sm:$0xff] %v394_v27  ;;  %v402_v31 = vld [vmem:[#allocation1 + $0x68] sm:$0xff] }
  0x25   :  { %397 = vst [vmem:[%s607_s1 + $0x50] sm:$0xff] %v396_v28  ;;  %399 = vst [vmem:[%s607_s1 + $0x58] sm:$0xff] %v398_v29 }
  0x26   :  { %401 = vst [vmem:[%s607_s1 + $0x60] sm:$0xff] %v400_v30  ;;  %403 = vst [vmem:[%s607_s1 + $0x68] sm:$0xff] %v402_v31 }
  0x27   :  { %v404_v32 = vld [vmem:[#allocation1 + $0x70] sm:$0xff] }
  0x28   :  { %405 = vst [vmem:[%s607_s1 + $0x70] sm:$0xff] %v404_v32 }
  0x29   :  { %v406_v33 = vld [vmem:[#allocation1 + $0x78] sm:$0xff] }
  0x2a   :  { %407 = vst [vmem:[%s607_s1 + $0x78] sm:$0xff] %v406_v33 }

// kernel: fdsm_forward.10
= control target key start
LH: loop header
LB: loop body
LE: loop exit
PB: predicated region body
PF: predicated region fallthrough
CT: control target
= control target key end

     0   :  { %s477_s12 = smov 0   ;;  %s479_s13 = smov 0   ;;  %s516_s0 = inlined_call_operand.vmem [shape: f32[2,8,256], index: 0, kind: input, shape index: {}]   ;;  %s517_s1 = inlined_call_operand.vmem [shape: f32[2,8,256], index: 1, kind: input, shape index: {}]   ;;  %s518_s2 = inlined_call_operand.vmem [shape: f32[2,8,1], index: 2, kind: output, shape index: {0}]   ;;  %s519_s3 = inlined_call_operand.vmem [shape: f32[2,8,1], index: 3, kind: output, shape index: {1}]  }
   0x1   :  { %s481_s14 = smov 0  }
   0x2 LB: > { %s26_s15 = sadd.s32 1, %s451_s13  ;;  %p398_p0 = scmp.ge.s32.totalorder %s455_s14, 1  ;;  %s455_s14 = sphi %s481_s14, %s14_s14   ;;  %s451_s13 = sphi %s479_s13, %s521_s13   ;;  %s447_s12 = sphi %s477_s12, %s520_s12  }
   0x3   : > { %p28_p1 = scmp.ge.s32.totalorder %s26_s15, 2  ;;  %p180_p2 = scmp.lt.s32.totalorder %s455_s14, 3 }
   0x5   : > { %s523_s15 = smov (%p28_p1, %s26_s15), 0  ;;  %p181_p3 = pnand %p398_p0, %p180_p2 }
   0x6   : > { %p223_p4 = scmp.lt.s32.totalorder (!%p181_p3), %s447_s12, 1 }
   0x7   : > { %184 = sbr.rel (%p181_p3) target bundleno = 164 (0xa4), region = 28 }
   0xc   : > { %s525_s12 = smov (!%p223_p4, %s447_s12), 1  ;;  %vm263_vm0 = vcmask 7168  }
   0xd   : > { %s407_s16 = sshll.u32 %s525_s12, 4  ;;  %s403_s23 = sshll.u32 %s525_s12, 3 }
   0xe   : > { %s230_s19 = scalar_lea.vmem %s516_s0, %s407_s16  ;;  %s240_s22 = scalar_lea.vmem %s517_s1, %s407_s16 }
   0xf   : > { %v254_v0 = vld [vmem:[%s230_s19] sm:$0xff]  ;;  %v255_v1 = vld [vmem:[%s230_s19 + $0x8] sm:$0xff]  ;;  %s246_s26 = scalar_lea.vmem %s518_s2, %s403_s23  ;;  %s252_s29 = scalar_lea.vmem %s519_s3, %s403_s23 }
  0x10   : > { %v256_v2 = vld [vmem:[%s240_s22] sm:$0xff]  ;;  %v257_v3 = vld [vmem:[%s240_s22 + $0x8] sm:$0xff] }
  0x11   : > { %v258_v4 = vadd.f32 %v256_v2, %v254_v0  ;;  %v259_v5 = vadd.f32 %v257_v3, %v255_v1 }
  0x13   : > { %v265_v6 = vmul.f32 %v258_v4, %v258_v4  ;;  %v260_v7 = vadd.f32 %v259_v5, %v258_v4  ;;  %v266_v8 = vmul.f32 %v259_v5, %v259_v5 }
  0x15   : > { %261 = vadd.xlane.f32.xlu0 %v260_v7  ;;  %v267_v9 = vadd.f32 %v266_v8, %v265_v6 }
  0x19   : > { %268 = vadd.xlane.f32.xlu0 %v267_v9 }
  0x9e   : > { %v262_v10 = vpop.xlane.xlu0 %261 }
  0x9f   : > { %264 = vst.msk [vmem:[%s246_s26] sm:$0xff] %vm263_vm0, %v262_v10 }
  0xa2   : > { %v269_v11 = vpop.xlane.xlu0 %268 }
  0xa3   : > { %270 = vst.msk [vmem:[%s252_s29] sm:$0xff] %vm263_vm0, %v269_v11 }
  0xa4 PF: > { %s14_s14 = sadd.s32 1, %s455_s14   ;;  %s520_s12 = smov %s451_s13 }
  0xa5   : > { %p11_p5 = scmp.ge.s32.totalorder %s14_s14, 4   ;;  %s521_s13 = smov %s523_s15 }
  0xa7   :  { %13 = sbr.rel (!%p11_p5) target bundleno = 2 (0x2), region = 73 }

// kernel: fdsm_forward.11
= control target key start
LH: loop header
LB: loop body
LE: loop exit
PB: predicated region body
PF: predicated region fallthrough
CT: control target
= control target key end

     0   :  { %s496_s15 = smov 0   ;;  %s498_s16 = smov 0   ;;  %s538_s0 = inlined_call_operand.vmem [shape: f32[2,8,256], index: 0, kind: input, shape index: {}]   ;;  %s539_s1 = inlined_call_operand.vmem [shape: f32[2,8,256], index: 1, kind: input, shape index: {}]   ;;  %s540_s2 = inlined_call_operand.vmem [shape: f32[8,1], index: 2, kind: input, shape index: {}]   ;;  %s541_s3 = inlined_call_operand.vmem [shape: f32[8,1], index: 3, kind: input, shape index: {}]   ;;  %s542_s4 = inlined_call_operand.vmem [shape: f32[2,8,256], index: 4, kind: output, shape index: {}]  }
   0x1   :  { %s500_s17 = smov 0  }
   0x2 LB: > { %s26_s18 = sadd.s32 1, %s464_s16  ;;  %p408_p0 = scmp.ge.s32.totalorder %s468_s17, 1  ;;  %s468_s17 = sphi %s500_s17, %s14_s17   ;;  %s464_s16 = sphi %s498_s16, %s544_s16   ;;  %s460_s15 = sphi %s496_s15, %s543_s15  }
   0x3   : > { %p28_p1 = scmp.ge.s32.totalorder %s26_s18, 2  ;;  %p200_p2 = scmp.lt.s32.totalorder %s468_s17, 3 }
   0x5   : > { %s546_s18 = smov (%p28_p1, %s26_s18), 0  ;;  %p201_p3 = pnand %p408_p0, %p200_p2 }
   0x6   : > { %p244_p4 = scmp.lt.s32.totalorder (!%p201_p3), %s460_s15, 1 }
   0x7   : > { %204 = sbr.rel (%p201_p3) target bundleno = 147 (0x93), region = 36 }
   0xc   : > { %v279_v0 = vld [vmem:[%s540_s2] sm:$0xff]  ;;  %v470_v1 = vmov 0   ;;  %s548_s15 = smov (!%p244_p4, %s460_s15), 1 }
   0xd   : > { %445 = vset.pattern.permute.xlu0 %v470_v1  ;;  %v287_v2 = vld [vmem:[%s541_s3] sm:$0xff]  ;;  %s417_s23 = sshll.u32 %s548_s15, 4 }
   0xe   : > { %282 = vperm.xlu0 %445, %v279_v0   ;;  %s251_s26 = scalar_lea.vmem %s538_s0, %s417_s23  ;;  %s261_s29 = scalar_lea.vmem %s539_s1, %s417_s23 }
   0xf   : > { %v273_v3 = vld [vmem:[%s251_s26] sm:$0xff]  ;;  %v274_v4 = vld [vmem:[%s251_s26 + $0x8] sm:$0xff]  ;;  %s271_s6 = scalar_lea.vmem %s542_s4, %s417_s23 }
  0x10   : > { %v275_v5 = vld [vmem:[%s261_s29] sm:$0xff]  ;;  %v276_v6 = vld [vmem:[%s261_s29 + $0x8] sm:$0xff] }
  0x11   : > { %v277_v7 = vadd.f32 %v275_v5, %v273_v3  ;;  %v278_v8 = vadd.f32 %v276_v6, %v274_v4 }
  0x12   : > { %290 = vperm.xlu0 %445, %v287_v2  }
  0x89   : > { %v283_v9 = vpop.permute.xlu0 %282 }
  0x8a   : > { %v285_v10 = vmul.f32 %v283_v9, %v277_v7  ;;  %v286_v11 = vmul.f32 %v283_v9, %v278_v8 }
  0x8d   : > { %v291_v12 = vpop.permute.xlu0 %290 }
  0x8e   : > { %v293_v13 = vadd.f32 %v291_v12, %v285_v10  ;;  %v294_v14 = vadd.f32 %v291_v12, %v286_v11 }
  0x90   : > { %v295_v15 = vmax.f32 %v293_v13, 0.0  ;;  %v296_v16 = vmax.f32 %v294_v14, 0.0 }
  0x92   : > { %297 = vst [vmem:[%s271_s6] sm:$0xff] %v295_v15  ;;  %298 = vst [vmem:[%s271_s6 + $0x8] sm:$0xff] %v296_v16 }
  0x93 PF: > { %s14_s17 = sadd.s32 1, %s468_s17   ;;  %s543_s15 = smov %s464_s16 }
  0x94   : > { %p11_p5 = scmp.ge.s32.totalorder %s14_s17, 4   ;;  %s544_s16 = smov %s546_s18 }
  0x96   :  { %13 = sbr.rel (!%p11_p5) target bundleno = 2 (0x2), region = 69 }

</bundles_post_ra>
